<compile_context>
chip_gen: v7x
topology: tpu7x:2x2x1
jax: 0.10.0
libtpu: 0.0.40
codegen_flags: <defaults>
</compile_context>

<pallas_src>
import jax
import jax.numpy as jnp
from jax.experimental import pallas as pl
from jax.experimental.pallas import tpu as pltpu

C_IN = 3
C1, C2, C3 = 94, 30, 79
C_OUT = C1 + C2 + C3  # 203
MIN_VALUE = 1.0  # torch.clamp_min(v4, 1)
MAX_VALUE = 0.0  # torch.clamp_max(v5, 0)
TILE_P = 2048    # pixels (lanes) per grid step


def _fused_conv1x1_concat_clamp_kernel(
    x1_ref, x2_ref, x3_ref,
    w1_ref, w2_ref, w3_ref,
    b1_ref, b2_ref, b3_ref,
    o_ref,
):
    # x*_ref: (3, T) channels-on-sublanes / pixels-on-lanes
    # w*_ref: (Cout_i, 3);  b*_ref: (Cout_i, 1);  o_ref: (203, T)
    def conv_clamp(x_ref, w_ref, b_ref):
        x = x_ref[...]
        w = w_ref[...]
        # Channel contraction (K=3) on the VPU: 3 broadcast multiply-adds.
        y = (w[:, 0:1] * x[0:1, :]
             + w[:, 1:2] * x[1:2, :]
             + w[:, 2:3] * x[2:3, :]
             + b_ref[...])
        # clamp_min(., 1) then clamp_max(., 0)
        return jnp.minimum(jnp.maximum(y, MIN_VALUE), MAX_VALUE)

    o_ref[pl.ds(0, C1), :] = conv_clamp(x1_ref, w1_ref, b1_ref).astype(o_ref.dtype)
    o_ref[pl.ds(C1, C2), :] = conv_clamp(x2_ref, w2_ref, b2_ref).astype(o_ref.dtype)
    o_ref[pl.ds(C1 + C2, C3), :] = conv_clamp(x3_ref, w3_ref, b3_ref).astype(o_ref.dtype)


def fused_model(x1, x2, x3, params):
    """x1, x2, x3: NCHW float32 arrays of shape (1, 3, H, W)."""
    (w1, b1), (w2, b2), (w3, b3) = params
    n, cin, H, W = x1.shape
    assert n == 1 and cin == C_IN
    P = H * W

    # Channels-on-sublanes / pixels-on-lanes: pure reshapes, no transpose pass.
    x1m = x1.reshape(C_IN, P).astype(jnp.float32)
    x2m = x2.reshape(C_IN, P).astype(jnp.float32)
    x3m = x3.reshape(C_IN, P).astype(jnp.float32)

    w1m = w1.reshape(C1, C_IN).astype(jnp.float32)
    w2m = w2.reshape(C2, C_IN).astype(jnp.float32)
    w3m = w3.reshape(C3, C_IN).astype(jnp.float32)
    b1m = b1.reshape(C1, 1).astype(jnp.float32)
    b2m = b2.reshape(C2, 1).astype(jnp.float32)
    b3m = b3.reshape(C3, 1).astype(jnp.float32)

    # Tile the pixel (lane) axis; small inputs run as a single full block.
    tile_p = P if P <= TILE_P else TILE_P
    grid = (pl.cdiv(P, tile_p),)

    x_spec = pl.BlockSpec((C_IN, tile_p), lambda i: (0, i))
    # Weights/biases: same block every step -> stay resident, no re-DMA.
    const = lambda shape: pl.BlockSpec(shape, lambda i: (0, 0))

    out = pl.pallas_call(
        _fused_conv1x1_concat_clamp_kernel,
        out_shape=jax.ShapeDtypeStruct((C_OUT, P), jnp.float32),
        grid=grid,
        in_specs=[
            x_spec, x_spec, x_spec,
            const((C1, C_IN)), const((C2, C_IN)), const((C3, C_IN)),
            const((C1, 1)), const((C2, 1)), const((C3, 1)),
        ],
        out_specs=pl.BlockSpec((C_OUT, tile_p), lambda i: (0, i)),
        compiler_params=pltpu.CompilerParams(
            dimension_semantics=("parallel",)),
    )(x1m, x2m, x3m, w1m, w2m, w3m, b1m, b2m, b3m)

    # (203, P) reshapes straight to NCHW -- no output transpose pass.
    return out.reshape(1, C_OUT, H, W)


def init_params(key):
    """Deterministic Conv2d(3, Cout, 1) params, PyTorch-style uniform init."""
    params = []
    bound = 1.0 / jnp.sqrt(jnp.float32(C_IN * 1 * 1))
    for cout in (C1, C2, C3):
        key, kw, kb = jax.random.split(key, 3)
        w = jax.random.uniform(kw, (cout, C_IN, 1, 1), jnp.float32, -bound, bound)
        b = jax.random.uniform(kb, (cout,), jnp.float32, -bound, bound)
        params.append((w, b))
    return params


def reference_model(x1, x2, x3, params):
    """Pure-JAX reference of the PyTorch forward."""
    outs = []
    for x, (w, b) in zip((x1, x2, x3), params):
        y = jnp.einsum("nchw,oc->nohw", x, w.reshape(w.shape[0], C_IN)) + b[None, :, None, None]
        outs.append(y)
    v4 = jnp.concatenate(outs, axis=1)
    v5 = jnp.maximum(v4, MIN_VALUE)
    v6 = jnp.minimum(v5, MAX_VALUE)
    return v6


if __name__ == "__main__":
    key = jax.random.PRNGKey(0)
    kp, k1, k2, k3 = jax.random.split(key, 4)
    params = init_params(kp)

    # Small spatial size consistent with the module's (1, 3, H, W) inputs.
    H, W = 16, 16
    x1 = jax.random.normal(k1, (1, C_IN, H, W), jnp.float32)
    x2 = jax.random.normal(k2, (1, C_IN, H, W), jnp.float32)
    x3 = jax.random.normal(k3, (1, C_IN, H, W), jnp.float32)

    out = fused_model(x1, x2, x3, params)
    out = jax.block_until_ready(out)

    ref = reference_model(x1, x2, x3, params)
    assert out.shape == (1, C_OUT, H, W), out.shape
    assert jnp.allclose(out, ref, atol=1e-5, rtol=1e-5), "mismatch vs reference"

    print("KERNEL_OK")
</pallas_src>

<mosaic_0001>
module attributes {stable_mosaic.version = 11 : i64} {
  func.func @_fused_conv1x1_concat_clamp_kernel(%arg0: i32, %arg1: memref<3x256xf32, #tpu.memory_space<vmem>>, %arg2: memref<3x256xf32, #tpu.memory_space<vmem>>, %arg3: memref<3x256xf32, #tpu.memory_space<vmem>>, %arg4: memref<94x3xf32, #tpu.memory_space<vmem>>, %arg5: memref<30x3xf32, #tpu.memory_space<vmem>>, %arg6: memref<79x3xf32, #tpu.memory_space<vmem>>, %arg7: memref<94x1xf32, #tpu.memory_space<vmem>>, %arg8: memref<30x1xf32, #tpu.memory_space<vmem>>, %arg9: memref<79x1xf32, #tpu.memory_space<vmem>>, %arg10: memref<203x256xf32, #tpu.memory_space<vmem>>) attributes {dimension_semantics = [#tpu.dimension_semantics<parallel>], iteration_bounds = array<i64: 1>, scalar_prefetch = 0 : i64, scratch_operands = 0 : i64, tpu.core_type = #tpu.core_type<tc>, window_params = [{transform_indices = @transform_0, window_bounds = array<i64: 3, 256>}, {transform_indices = @transform_1, window_bounds = array<i64: 3, 256>}, {transform_indices = @transform_2, window_bounds = array<i64: 3, 256>}, {pipeline_mode = #tpu.pipeline_mode<synchronous>, transform_indices = @transform_3, window_bounds = array<i64: 94, 3>}, {pipeline_mode = #tpu.pipeline_mode<synchronous>, transform_indices = @transform_4, window_bounds = array<i64: 30, 3>}, {pipeline_mode = #tpu.pipeline_mode<synchronous>, transform_indices = @transform_5, window_bounds = array<i64: 79, 3>}, {pipeline_mode = #tpu.pipeline_mode<synchronous>, transform_indices = @transform_6, window_bounds = array<i64: 94, 1>}, {pipeline_mode = #tpu.pipeline_mode<synchronous>, transform_indices = @transform_7, window_bounds = array<i64: 30, 1>}, {pipeline_mode = #tpu.pipeline_mode<synchronous>, transform_indices = @transform_8, window_bounds = array<i64: 79, 1>}, {transform_indices = @transform_9, window_bounds = array<i64: 203, 256>}]} {
    %c0 = arith.constant 0 : index
    %c0_0 = arith.constant 0 : index
    %0 = vector.load %arg1[%c0, %c0_0] : memref<3x256xf32, #tpu.memory_space<vmem>>, vector<3x256xf32>
    %c0_1 = arith.constant 0 : index
    %c0_2 = arith.constant 0 : index
    %1 = vector.load %arg4[%c0_1, %c0_2] : memref<94x3xf32, #tpu.memory_space<vmem>>, vector<94x3xf32>
    %2 = vector.extract_strided_slice %1 {offsets = [0, 0], sizes = [94, 1], strides = [1, 1]} : vector<94x3xf32> to vector<94x1xf32>
    %3 = vector.extract_strided_slice %0 {offsets = [0, 0], sizes = [1, 256], strides = [1, 1]} : vector<3x256xf32> to vector<1x256xf32>
    %4 = vector.broadcast %2 : vector<94x1xf32> to vector<94x256xf32>
    %5 = vector.broadcast %3 : vector<1x256xf32> to vector<94x256xf32>
    %6 = arith.mulf %4, %5 : vector<94x256xf32>
    %7 = vector.extract_strided_slice %1 {offsets = [0, 1], sizes = [94, 1], strides = [1, 1]} : vector<94x3xf32> to vector<94x1xf32>
    %8 = vector.extract_strided_slice %0 {offsets = [1, 0], sizes = [1, 256], strides = [1, 1]} : vector<3x256xf32> to vector<1x256xf32>
    %9 = vector.broadcast %7 : vector<94x1xf32> to vector<94x256xf32>
    %10 = vector.broadcast %8 : vector<1x256xf32> to vector<94x256xf32>
    %11 = arith.mulf %9, %10 : vector<94x256xf32>
    %12 = arith.addf %6, %11 : vector<94x256xf32>
    %13 = vector.extract_strided_slice %1 {offsets = [0, 2], sizes = [94, 1], strides = [1, 1]} : vector<94x3xf32> to vector<94x1xf32>
    %14 = vector.extract_strided_slice %0 {offsets = [2, 0], sizes = [1, 256], strides = [1, 1]} : vector<3x256xf32> to vector<1x256xf32>
    %15 = vector.broadcast %13 : vector<94x1xf32> to vector<94x256xf32>
    %16 = vector.broadcast %14 : vector<1x256xf32> to vector<94x256xf32>
    %17 = arith.mulf %15, %16 : vector<94x256xf32>
    %18 = arith.addf %12, %17 : vector<94x256xf32>
    %c0_3 = arith.constant 0 : index
    %c0_4 = arith.constant 0 : index
    %19 = vector.load %arg7[%c0_3, %c0_4] : memref<94x1xf32, #tpu.memory_space<vmem>>, vector<94x1xf32>
    %20 = vector.broadcast %19 : vector<94x1xf32> to vector<94x256xf32>
    %21 = arith.addf %18, %20 : vector<94x256xf32>
    %cst = arith.constant 1.000000e+00 : f32
    %22 = vector.broadcast %cst : f32 to vector<94x256xf32>
    %23 = arith.maximumf %21, %22 : vector<94x256xf32>
    %cst_5 = arith.constant 0.000000e+00 : f32
    %24 = vector.broadcast %cst_5 : f32 to vector<94x256xf32>
    %25 = arith.minimumf %23, %24 : vector<94x256xf32>
    %c0_6 = arith.constant 0 : index
    %c0_7 = arith.constant 0 : index
    %26 = vector.load %arg10[%c0_6, %c0_7] : memref<203x256xf32, #tpu.memory_space<vmem>>, vector<94x256xf32>
    tpu.vector_store %arg10[%c0_6, %c0_7], %25 {strides = array<i32>} : memref<203x256xf32, #tpu.memory_space<vmem>>, vector<94x256xf32>,
    %c0_8 = arith.constant 0 : index
    %c0_9 = arith.constant 0 : index
    %27 = vector.load %arg2[%c0_8, %c0_9] : memref<3x256xf32, #tpu.memory_space<vmem>>, vector<3x256xf32>
    %c0_10 = arith.constant 0 : index
    %c0_11 = arith.constant 0 : index
    %28 = vector.load %arg5[%c0_10, %c0_11] : memref<30x3xf32, #tpu.memory_space<vmem>>, vector<30x3xf32>
    %29 = vector.extract_strided_slice %28 {offsets = [0, 0], sizes = [30, 1], strides = [1, 1]} : vector<30x3xf32> to vector<30x1xf32>
    %30 = vector.extract_strided_slice %27 {offsets = [0, 0], sizes = [1, 256], strides = [1, 1]} : vector<3x256xf32> to vector<1x256xf32>
    %31 = vector.broadcast %29 : vector<30x1xf32> to vector<30x256xf32>
    %32 = vector.broadcast %30 : vector<1x256xf32> to vector<30x256xf32>
    %33 = arith.mulf %31, %32 : vector<30x256xf32>
    %34 = vector.extract_strided_slice %28 {offsets = [0, 1], sizes = [30, 1], strides = [1, 1]} : vector<30x3xf32> to vector<30x1xf32>
    %35 = vector.extract_strided_slice %27 {offsets = [1, 0], sizes = [1, 256], strides = [1, 1]} : vector<3x256xf32> to vector<1x256xf32>
    %36 = vector.broadcast %34 : vector<30x1xf32> to vector<30x256xf32>
    %37 = vector.broadcast %35 : vector<1x256xf32> to vector<30x256xf32>
    %38 = arith.mulf %36, %37 : vector<30x256xf32>
    %39 = arith.addf %33, %38 : vector<30x256xf32>
    %40 = vector.extract_strided_slice %28 {offsets = [0, 2], sizes = [30, 1], strides = [1, 1]} : vector<30x3xf32> to vector<30x1xf32>
    %41 = vector.extract_strided_slice %27 {offsets = [2, 0], sizes = [1, 256], strides = [1, 1]} : vector<3x256xf32> to vector<1x256xf32>
    %42 = vector.broadcast %40 : vector<30x1xf32> to vector<30x256xf32>
    %43 = vector.broadcast %41 : vector<1x256xf32> to vector<30x256xf32>
    %44 = arith.mulf %42, %43 : vector<30x256xf32>
    %45 = arith.addf %39, %44 : vector<30x256xf32>
    %c0_12 = arith.constant 0 : index
    %c0_13 = arith.constant 0 : index
    %46 = vector.load %arg8[%c0_12, %c0_13] : memref<30x1xf32, #tpu.memory_space<vmem>>, vector<30x1xf32>
    %47 = vector.broadcast %46 : vector<30x1xf32> to vector<30x256xf32>
    %48 = arith.addf %45, %47 : vector<30x256xf32>
    %cst_14 = arith.constant 1.000000e+00 : f32
    %49 = vector.broadcast %cst_14 : f32 to vector<30x256xf32>
    %50 = arith.maximumf %48, %49 : vector<30x256xf32>
    %cst_15 = arith.constant 0.000000e+00 : f32
    %51 = vector.broadcast %cst_15 : f32 to vector<30x256xf32>
    %52 = arith.minimumf %50, %51 : vector<30x256xf32>
    %c94 = arith.constant 94 : index
    %c0_16 = arith.constant 0 : index
    %53 = vector.load %arg10[%c94, %c0_16] : memref<203x256xf32, #tpu.memory_space<vmem>>, vector<30x256xf32>
    tpu.vector_store %arg10[%c94, %c0_16], %52 {strides = array<i32>} : memref<203x256xf32, #tpu.memory_space<vmem>>, vector<30x256xf32>,
    %c0_17 = arith.constant 0 : index
    %c0_18 = arith.constant 0 : index
    %54 = vector.load %arg3[%c0_17, %c0_18] : memref<3x256xf32, #tpu.memory_space<vmem>>, vector<3x256xf32>
    %c0_19 = arith.constant 0 : index
    %c0_20 = arith.constant 0 : index
    %55 = vector.load %arg6[%c0_19, %c0_20] : memref<79x3xf32, #tpu.memory_space<vmem>>, vector<79x3xf32>
    %56 = vector.extract_strided_slice %55 {offsets = [0, 0], sizes = [79, 1], strides = [1, 1]} : vector<79x3xf32> to vector<79x1xf32>
    %57 = vector.extract_strided_slice %54 {offsets = [0, 0], sizes = [1, 256], strides = [1, 1]} : vector<3x256xf32> to vector<1x256xf32>
    %58 = vector.broadcast %56 : vector<79x1xf32> to vector<79x256xf32>
    %59 = vector.broadcast %57 : vector<1x256xf32> to vector<79x256xf32>
    %60 = arith.mulf %58, %59 : vector<79x256xf32>
    %61 = vector.extract_strided_slice %55 {offsets = [0, 1], sizes = [79, 1], strides = [1, 1]} : vector<79x3xf32> to vector<79x1xf32>
    %62 = vector.extract_strided_slice %54 {offsets = [1, 0], sizes = [1, 256], strides = [1, 1]} : vector<3x256xf32> to vector<1x256xf32>
    %63 = vector.broadcast %61 : vector<79x1xf32> to vector<79x256xf32>
    %64 = vector.broadcast %62 : vector<1x256xf32> to vector<79x256xf32>
    %65 = arith.mulf %63, %64 : vector<79x256xf32>
    %66 = arith.addf %60, %65 : vector<79x256xf32>
    %67 = vector.extract_strided_slice %55 {offsets = [0, 2], sizes = [79, 1], strides = [1, 1]} : vector<79x3xf32> to vector<79x1xf32>
    %68 = vector.extract_strided_slice %54 {offsets = [2, 0], sizes = [1, 256], strides = [1, 1]} : vector<3x256xf32> to vector<1x256xf32>
    %69 = vector.broadcast %67 : vector<79x1xf32> to vector<79x256xf32>
    %70 = vector.broadcast %68 : vector<1x256xf32> to vector<79x256xf32>
    %71 = arith.mulf %69, %70 : vector<79x256xf32>
    %72 = arith.addf %66, %71 : vector<79x256xf32>
    %c0_21 = arith.constant 0 : index
    %c0_22 = arith.constant 0 : index
    %73 = vector.load %arg9[%c0_21, %c0_22] : memref<79x1xf32, #tpu.memory_space<vmem>>, vector<79x1xf32>
    %74 = vector.broadcast %73 : vector<79x1xf32> to vector<79x256xf32>
    %75 = arith.addf %72, %74 : vector<79x256xf32>
    %cst_23 = arith.constant 1.000000e+00 : f32
    %76 = vector.broadcast %cst_23 : f32 to vector<79x256xf32>
    %77 = arith.maximumf %75, %76 : vector<79x256xf32>
    %cst_24 = arith.constant 0.000000e+00 : f32
    %78 = vector.broadcast %cst_24 : f32 to vector<79x256xf32>
    %79 = arith.minimumf %77, %78 : vector<79x256xf32>
    %c124 = arith.constant 124 : index
    %c0_25 = arith.constant 0 : index
    %80 = vector.load %arg10[%c124, %c0_25] : memref<203x256xf32, #tpu.memory_space<vmem>>, vector<79x256xf32>
    tpu.vector_store %arg10[%c124, %c0_25], %79 {strides = array<i32>} : memref<203x256xf32, #tpu.memory_space<vmem>>, vector<79x256xf32>,
    return
  }
  func.func @transform_0(%arg0: i32) -> (i32, i32) {
    %c0_i32 = arith.constant 0 : i32
    %c0_i32_0 = arith.constant 0 : i32
    return %c0_i32, %arg0 : i32, i32
  }
  func.func @transform_1(%arg0: i32) -> (i32, i32) {
    %c0_i32 = arith.constant 0 : i32
    %c0_i32_0 = arith.constant 0 : i32
    return %c0_i32, %arg0 : i32, i32
  }
  func.func @transform_2(%arg0: i32) -> (i32, i32) {
    %c0_i32 = arith.constant 0 : i32
    %c0_i32_0 = arith.constant 0 : i32
    return %c0_i32, %arg0 : i32, i32
  }
  func.func @transform_3(%arg0: i32) -> (i32, i32) {
    %c0_i32 = arith.constant 0 : i32
    %c0_i32_0 = arith.constant 0 : i32
    %c0_i32_1 = arith.constant 0 : i32
    return %c0_i32, %c0_i32_0 : i32, i32
  }
  func.func @transform_4(%arg0: i32) -> (i32, i32) {
    %c0_i32 = arith.constant 0 : i32
    %c0_i32_0 = arith.constant 0 : i32
    %c0_i32_1 = arith.constant 0 : i32
    return %c0_i32, %c0_i32_0 : i32, i32
  }
  func.func @transform_5(%arg0: i32) -> (i32, i32) {
    %c0_i32 = arith.constant 0 : i32
    %c0_i32_0 = arith.constant 0 : i32
    %c0_i32_1 = arith.constant 0 : i32
    return %c0_i32, %c0_i32_0 : i32, i32
  }
  func.func @transform_6(%arg0: i32) -> (i32, i32) {
    %c0_i32 = arith.constant 0 : i32
    %c0_i32_0 = arith.constant 0 : i32
    %c0_i32_1 = arith.constant 0 : i32
    return %c0_i32, %c0_i32_0 : i32, i32
  }
  func.func @transform_7(%arg0: i32) -> (i32, i32) {
    %c0_i32 = arith.constant 0 : i32
    %c0_i32_0 = arith.constant 0 : i32
    %c0_i32_1 = arith.constant 0 : i32
    return %c0_i32, %c0_i32_0 : i32, i32
  }
  func.func @transform_8(%arg0: i32) -> (i32, i32) {
    %c0_i32 = arith.constant 0 : i32
    %c0_i32_0 = arith.constant 0 : i32
    %c0_i32_1 = arith.constant 0 : i32
    return %c0_i32, %c0_i32_0 : i32, i32
  }
  func.func @transform_9(%arg0: i32) -> (i32, i32) {
    %c0_i32 = arith.constant 0 : i32
    %c0_i32_0 = arith.constant 0 : i32
    return %c0_i32, %arg0 : i32, i32
  }
}

</mosaic_0001>

<bundles_post_ra>
// kernel: tpu_custom_call.1
= control target key start
LH: loop header
LB: loop body
LE: loop exit
PB: predicated region body
PF: predicated region fallthrough
CT: control target
= control target key end

     0   :  { %v1367_v2 = vmov 1   ;;  %v2329_v3 = vmov 0   ;;  %s2319_s0 = inlined_call_operand.vmem [shape: f32[3,256], index: 0, kind: input, shape index: {}]   ;;  %s2320_s1 = inlined_call_operand.vmem [shape: f32[3,256], index: 1, kind: input, shape index: {}]   ;;  %s2321_s2 = inlined_call_operand.vmem [shape: f32[3,256], index: 2, kind: input, shape index: {}]   ;;  %s2322_s3 = inlined_call_operand.vmem [shape: f32[94,3], index: 3, kind: input, shape index: {}]   ;;  %s2323_s4 = inlined_call_operand.vmem [shape: f32[30,3], index: 4, kind: input, shape index: {}]   ;;  %s2324_s5 = inlined_call_operand.vmem [shape: f32[79,3], index: 5, kind: input, shape index: {}]   ;;  %s2325_s6 = inlined_call_operand.vmem [shape: f32[94,1], index: 6, kind: input, shape index: {}]   ;;  %s2326_s7 = inlined_call_operand.vmem [shape: f32[30,1], index: 7, kind: input, shape index: {}]   ;;  %s2327_s8 = inlined_call_operand.vmem [shape: f32[79,1], index: 8, kind: input, shape index: {}]   ;;  %s2328_s9 = inlined_call_operand.hbm [shape: f32[203,256], index: 9, kind: output, shape index: {}]  }
   0x1   :  { %v36_v0 = vld [vmem:[%s2322_s3 + $0x10] sm:$0xff]  ;;  %v1429_v1 = vld [vmem:[%s2322_s3] sm:$0xff]  ;;  %1330 = vset.pattern.permute.xlu0 %v1367_v2  ;;  %1329 = vset.pattern.permute.xlu1 %v2329_v3  ;;  %v37_v4 = vld [vmem:[%s2322_s3 + $0x18] sm:$0xff] }
   0x2   :  { %58 = vperm.xlu1 %1329, %v36_v0   ;;  %150 = vperm.xlu0 %1330, %v1429_v1   ;;  %v39_v5 = vld [vmem:[%s2322_s3 + $0x28] sm:$0xff]  ;;  %v41_v6 = vld [vmem:[%s2322_s3 + $0x38] sm:$0xff] }
   0x6   :  { %63 = vperm.xlu1 %1329, %v37_v4   ;;  %162 = vperm.xlu0 %1330, %v37_v4  }
   0xa   :  { %73 = vperm.xlu1 %1329, %v39_v5   ;;  %170 = vperm.xlu0 %1330, %v39_v5  }
   0xb   :  { %14 = vsyncpa [#allocation3], 0  ;;  %v43_v7 = vld [vmem:[%s2322_s3 + $0x48] sm:$0xff]  ;;  %v45_v8 = vld [vmem:[%s2322_s3 + $0x58] sm:$0x3f]  ;;  %v107_v9 = vlaneseq  ;;  %v1369_v27 = vmov 2  }
   0xc   :  { %v1452_v10 = vld [vmem:[%s2323_s4 + $0x8] sm:$0xff]  ;;  %v1467_v13 = vld [vmem:[%s2324_s5] sm:$0xff]  ;;  %v1486_v18 = vld [vmem:[%s2324_s5 + $0x18] sm:$0xff]  ;;  %vm753_vm0 = vcmask 1045504   ;;  %vm1224_vm1 = vcmask 1043456  }
   0xd   :  { %v1457_v11 = vld [vmem:[%s2322_s3 + $0x8] sm:$0xff]  ;;  %v1459_v12 = vshrl.u32 %v107_v9, 7  ;;  %v1475_v15 = vld [vmem:[%s2321_s2] sm:$0x77]  ;;  %v40_v22 = vld [vmem:[%s2322_s3 + $0x30] sm:$0xff] }
   0xe   :  { %83 = vperm.xlu1 %1329, %v41_v6   ;;  %178 = vperm.xlu0 %1330, %v41_v6   ;;  %v38_v20 = vld [vmem:[%s2322_s3 + $0x20] sm:$0xff]  ;;  %v1498_v21 = vld [vmem:[%s2324_s5 + $0x28] sm:$0xff]  ;;  %v1507_v23 = vld [vmem:[%s2324_s5 + $0x38] sm:$0xff] }
   0xf   :  { %v1470_v14 = vsub.s32 5, %v1459_v12  ;;  %v1478_v16 = vsub.s32 1, %v1459_v12  ;;  %v42_v24 = vld [vmem:[%s2322_s3 + $0x40] sm:$0xff]  ;;  %v1516_v25 = vld [vmem:[%s2324_s5 + $0x48] sm:$0x7f]  ;;  %v44_v26 = vld [vmem:[%s2322_s3 + $0x50] sm:$0xff] }
  0x10   :  { %v546_v28 = vld [vmem:[%s2323_s4] sm:$0xff]  ;;  %v1532_v29 = vld [vmem:[%s2323_s4 + $0x18] sm:$0x3f]  ;;  %v1538_v30 = vld [vmem:[%s2324_s5 + $0x8] sm:$0xff]  ;;  %v1541_v31 = vsub.s32 6, %v1459_v12  ;;  %v1547_v33 = vsub.s32 2, %v1459_v12 }
  0x11   :  { %v935_v17 = vrot.slane %v1475_v15, %v1470_v14  ;;  %v378_v32 = vld [vmem:[%s2325_s6 + $0x8] sm:$0xff]  ;;  %v1556_v35 = vld [vmem:[%s2324_s5 + $0x20] sm:$0xff]  ;;  %v379_v37 = vld [vmem:[%s2325_s6 + $0x10] sm:$0xff] }
  0x12   :  { %93 = vperm.xlu1 %1329, %v43_v7   ;;  %186 = vperm.xlu0 %1330, %v43_v7   ;;  %v1033_v34 = vrot.slane %v1475_v15, %v1541_v31  ;;  %v1568_v38 = vld [vmem:[%s2324_s5 + $0x30] sm:$0xff]  ;;  %v381_v39 = vld [vmem:[%s2325_s6 + $0x20] sm:$0xff]  ;;  %v380_v46 = vld [vmem:[%s2325_s6 + $0x18] sm:$0xff] }
  0x13   :  { %v1489_v19 = vrot.slane %v935_v17, %v1478_v16  ;;  %v1577_v40 = vld [vmem:[%s2324_s5 + $0x40] sm:$0xff]  ;;  %v383_v41 = vld [vmem:[%s2325_s6 + $0x30] sm:$0xff]  ;;  %v382_v47 = vld [vmem:[%s2325_s6 + $0x28] sm:$0xff] }
  0x14   :  { %v1559_v36 = vrot.slane %v1033_v34, %v1547_v33  ;;  %v385_v42 = vld [vmem:[%s2325_s6 + $0x40] sm:$0xff]  ;;  %v387_v43 = vld [vmem:[%s2325_s6 + $0x50] sm:$0xff]  ;;  %v384_v50 = vld [vmem:[%s2325_s6 + $0x38] sm:$0xff] }
  0x15   :  { %2345 = vst [vmem:[#allocation5_spill] sm:$0xff] %v1489_v19  ;;  %v548_v44 = vld [vmem:[%s2323_s4 + $0x10] sm:$0xff]  ;;  %v377_v45 = vld [vmem:[%s2325_s6] sm:$0xff]  ;;  %v386_v54 = vld [vmem:[%s2325_s6 + $0x48] sm:$0xff] }
  0x16   :  { %103 = vperm.xlu1 %1329, %v45_v8   ;;  %194 = vperm.xlu0 %1330, %v45_v8   ;;  %2346 = vst [vmem:[#allocation6_spill] sm:$0xff] %v1559_v36  ;;  %v697_v53 = vld [vmem:[%s2326_s7] sm:$0xff]  ;;  %v699_v57 = vld [vmem:[%s2326_s7 + $0x10] sm:$0xff]  ;;  %v388_v58 = vld [vmem:[%s2325_s6 + $0x58] sm:$0x3f] }
  0x17   :  { %v700_v61 = vld [vmem:[%s2326_s7 + $0x18] sm:$0x3f] }
  0x1a   :  { %1331 = vset.pattern.permute.xlu1 %v1367_v2  ;;  %602 = vperm.xlu0 %1330, %v1452_v10  }
  0x1b   :  { %154 = vperm.xlu1 %1331, %v1457_v11  }
  0x1e   :  { %889 = vperm.xlu0 %1330, %v1467_v13  }
  0x1f   :  { %158 = vperm.xlu1 %1331, %v36_v0  }
  0x22   :  { %901 = vperm.xlu0 %1330, %v1486_v18  }
  0x23   :  { %166 = vperm.xlu1 %1331, %v38_v20  }
  0x26   :  { %909 = vperm.xlu0 %1330, %v1498_v21  }
  0x27   :  { %174 = vperm.xlu1 %1331, %v40_v22  }
  0x2a   :  { %917 = vperm.xlu0 %1330, %v1507_v23  }
  0x2b   :  { %182 = vperm.xlu1 %1331, %v42_v24  }
  0x2e   :  { %925 = vperm.xlu0 %1330, %v1516_v25  }
  0x2f   :  { %190 = vperm.xlu1 %1331, %v44_v26  }
  0x32   :  { %1338 = vset.pattern.permute.xlu0 %v1369_v27 }
  0x33   :  { %1332 = vset.pattern.permute.xlu1 %v1369_v27  ;;  %268 = vperm.xlu0 %1338, %v1457_v11  }
  0x34   :  { %264 = vperm.xlu1 %1332, %v1429_v1  }
  0x37   :  { %280 = vperm.xlu0 %1338, %v38_v20  }
  0x38   :  { %272 = vperm.xlu1 %1332, %v36_v0  }
  0x3b   :  { %288 = vperm.xlu0 %1338, %v40_v22  }
  0x3c   :  { %276 = vperm.xlu1 %1332, %v37_v4   ;;  %v698_v4 = vld [vmem:[%s2326_s7 + $0x8] sm:$0xff] }
  0x3f   :  { %296 = vperm.xlu0 %1338, %v42_v24  }
  0x40   :  { %284 = vperm.xlu1 %1332, %v39_v5   ;;  %v931_v5 = vrot.slane %v1475_v15, %v1478_v16 }
  0x43   :  { %304 = vperm.xlu0 %1338, %v44_v26  }
  0x44   :  { %292 = vperm.xlu1 %1332, %v41_v6  }
  0x47   :  { %648 = vperm.xlu0 %1338, %v546_v28  }
  0x48   :  { %300 = vperm.xlu1 %1332, %v43_v7  }
  0x4b   :  { %660 = vperm.xlu0 %1338, %v1532_v29  }
  0x4c   :  { %308 = vperm.xlu1 %1332, %v45_v8   ;;  %v1665_v8 = vrot.slane %v931_v5, %v1478_v16 }
  0x4e   :  { %2348 = vst [vmem:[#allocation8_spill] sm:$0xff] %v1665_v8 }
  0x4f   :  { %991 = vperm.xlu0 %1338, %v1538_v30  }
  0x50   :  { %1333 = vset.pattern.permute.xlu1 %v2329_v3 }
  0x51   :  { %396 = vperm.xlu1 %1333, %v378_v32  }
  0x53   :  { %1003 = vperm.xlu0 %1338, %v1556_v35  }
  0x55   :  { %401 = vperm.xlu1 %1333, %v379_v37  }
  0x57   :  { %1011 = vperm.xlu0 %1338, %v1568_v38  }
  0x59   :  { %411 = vperm.xlu1 %1333, %v381_v39  }
  0x5b   :  { %1019 = vperm.xlu0 %1338, %v1577_v40  }
  0x5d   :  { %421 = vperm.xlu1 %1333, %v383_v41  }
  0x5f   :  { %1340 = vset.pattern.permute.xlu0 %v2329_v3 }
  0x60   :  { %48 = vperm.xlu0 %1340, %v1429_v1  }
  0x61   :  { %431 = vperm.xlu1 %1333, %v385_v42  }
  0x64   :  { %53 = vperm.xlu0 %1340, %v1457_v11  }
  0x65   :  { %441 = vperm.xlu1 %1333, %v387_v43  }
  0x68   :  { %68 = vperm.xlu0 %1340, %v38_v20  }
  0x69   :  { %552 = vperm.xlu1 %1333, %v546_v28  }
  0x6c   :  { %78 = vperm.xlu0 %1340, %v40_v22  }
  0x6d   :  { %562 = vperm.xlu1 %1333, %v548_v44  }
  0x70   :  { %88 = vperm.xlu0 %1340, %v42_v24  }
  0x71   :  { %1334 = vset.pattern.permute.xlu1 %v1367_v2 }
  0x72   :  { %598 = vperm.xlu1 %1334, %v546_v28  }
  0x74   :  { %98 = vperm.xlu0 %1340, %v44_v26  }
  0x76   :  { %606 = vperm.xlu1 %1334, %v548_v44  }
  0x78   :  { %391 = vperm.xlu0 %1340, %v377_v45  }
  0x7a   :  { %610 = vperm.xlu1 %1334, %v1532_v29  }
  0x7c   :  { %406 = vperm.xlu0 %1340, %v380_v46  }
  0x7e   :  { %1335 = vset.pattern.permute.xlu1 %v1369_v27 }
  0x7f   :  { %652 = vperm.xlu1 %1335, %v1452_v10  }
  0x80   :  { %416 = vperm.xlu0 %1340, %v382_v47   ;;  %v1087_v47 = vld [vmem:[%s2327_s8 + $0x18] sm:$0xff] }
  0x81   :  { %v1608_v48 = vpop.permute.xlu1 %58  ;;  %v1610_v49 = vpop.permute.xlu0 %150 }
  0x83   :  { %656 = vperm.xlu1 %1335, %v548_v44  }
  0x84   :  { %426 = vperm.xlu0 %1340, %v384_v50  }
  0x85   :  { %v1615_v51 = vpop.permute.xlu1 %63  ;;  %v1617_v52 = vpop.permute.xlu0 %162 }
  0x87   :  { %1336 = vset.pattern.permute.xlu1 %v2329_v3 }
  0x88   :  { %703 = vperm.xlu1 %1336, %v697_v53   ;;  %436 = vperm.xlu0 %1340, %v386_v54   ;;  %v1089_v54 = vld [vmem:[%s2327_s8 + $0x28] sm:$0xff] }
  0x89   :  { %v1626_v55 = vpop.permute.xlu1 %73  ;;  %v1628_v56 = vpop.permute.xlu0 %170 }
  0x8c   :  { %713 = vperm.xlu1 %1336, %v699_v57   ;;  %446 = vperm.xlu0 %1340, %v388_v58  }
  0x8d   :  { %v1636_v59 = vpop.permute.xlu1 %83  ;;  %v1638_v60 = vpop.permute.xlu0 %178 }
  0x90   :  { %718 = vperm.xlu1 %1336, %v700_v61   ;;  %557 = vperm.xlu0 %1340, %v1452_v10   ;;  %v791_v10 = vld [vmem:[%s2324_s5 + $0x10] sm:$0xff] }
  0x91   :  { %v1644_v62 = vpop.permute.xlu1 %93  ;;  %v1646_v63 = vpop.permute.xlu0 %186 }
  0x94   :  { %806 = vperm.xlu1 %1336, %v1538_v30   ;;  %567 = vperm.xlu0 %1340, %v1532_v29  }
  0x95   :  { %v1650_v0 = vpop.permute.xlu1 %103  ;;  %v1652_v1 = vpop.permute.xlu0 %194 }
  0x98   :  { %816 = vperm.xlu1 %1336, %v1486_v18   ;;  %708 = vperm.xlu0 %1340, %v698_v4  }
  0x99   :  { %v1660_v6 = vpop.permute.xlu0 %602 }
  0x9a   :  { %2347 = vst [vmem:[#allocation7_spill] sm:$0xff] %v1660_v6  ;;  %v1662_v7 = vpop.permute.xlu1 %154 }
  0x9c   :  { %826 = vperm.xlu1 %1336, %v1498_v21   ;;  %801 = vperm.xlu0 %1340, %v1467_v13  }
  0x9d   :  { %v890_v9 = vpop.permute.xlu0 %889 }
  0x9e   :  { %v1673_v11 = vmul.f32 %v1665_v8, %v890_v9  ;;  %v1676_v17 = vmul.f32 %v1489_v19, %v890_v9  ;;  %v1678_v20 = vpop.permute.xlu1 %158  ;;  %v1754_v9 = vsub.s32 0, %v1459_v12 }
  0xa0   :  { %2349 = vst [vmem:[#allocation9_spill] sm:$0xff] %v1673_v11  ;;  %2350 = vst [vmem:[#allocation10_spill] sm:$0xff] %v1676_v17  ;;  %836 = vperm.xlu1 %1336, %v1507_v23   ;;  %811 = vperm.xlu0 %1340, %v791_v10  }
  0xa1   :  { %v902_v22 = vpop.permute.xlu0 %901  ;;  %2359 = vst [vmem:[#allocation19_spill] sm:$0xff] %v1754_v9 }
  0xa2   :  { %v1682_v24 = vmul.f32 %v1665_v8, %v902_v22  ;;  %v1685_v26 = vmul.f32 %v1489_v19, %v902_v22  ;;  %v1687_v28 = vpop.permute.xlu1 %166  ;;  %v1757_v22 = vsub.s32 4, %v1459_v12 }
  0xa4   :  { %2351 = vst [vmem:[#allocation11_spill] sm:$0xff] %v1682_v24  ;;  %2352 = vst [vmem:[#allocation12_spill] sm:$0xff] %v1685_v26  ;;  %846 = vperm.xlu1 %1336, %v1516_v25   ;;  %821 = vperm.xlu0 %1340, %v1556_v35  }
  0xa5   :  { %v910_v29 = vpop.permute.xlu0 %909  ;;  %2360 = vst [vmem:[#allocation20_spill] sm:$0xff] %v1757_v22 }
  0xa6   :  { %v1692_v32 = vmul.f32 %v1665_v8, %v910_v29  ;;  %v1695_v34 = vmul.f32 %v1489_v19, %v910_v29  ;;  %v1697_v37 = vpop.permute.xlu1 %174 }
  0xa8   :  { %2353 = vst [vmem:[#allocation13_spill] sm:$0xff] %v1692_v32  ;;  %2354 = vst [vmem:[#allocation14_spill] sm:$0xff] %v1695_v34  ;;  %1337 = vset.pattern.permute.xlu1 %v1367_v2  ;;  %831 = vperm.xlu0 %1340, %v1568_v38   ;;  %v1084_v2 = vld [vmem:[%s2327_s8] sm:$0xff] }
  0xa9   :  { %893 = vperm.xlu1 %1337, %v1538_v30   ;;  %v918_v39 = vpop.permute.xlu0 %917 }
  0xaa   :  { %v1703_v41 = vmul.f32 %v1665_v8, %v918_v39  ;;  %v1706_v42 = vmul.f32 %v1489_v19, %v918_v39  ;;  %v1708_v43 = vpop.permute.xlu1 %182 }
  0xac   :  { %2355 = vst [vmem:[#allocation15_spill] sm:$0xff] %v1703_v41  ;;  %2356 = vst [vmem:[#allocation16_spill] sm:$0xff] %v1706_v42  ;;  %841 = vperm.xlu0 %1340, %v1577_v40  }
  0xad   :  { %897 = vperm.xlu1 %1337, %v791_v10   ;;  %v926_v44 = vpop.permute.xlu0 %925 }
  0xae   :  { %v1715_v45 = vmul.f32 %v1665_v8, %v926_v44  ;;  %v1718_v30 = vmul.f32 %v1489_v19, %v926_v44  ;;  %v1720_v46 = vpop.permute.xlu1 %190 }
  0xb0   :  { %2357 = vst [vmem:[#allocation17_spill] sm:$0xff] %v1715_v45  ;;  %2358 = vst [vmem:[#allocation18_spill] sm:$0xff] %v1718_v30  ;;  %1096 = vperm.xlu0 %1340, %v1084_v2  }
  0xb1   :  { %905 = vperm.xlu1 %1337, %v1556_v35   ;;  %v1091_v35 = vld [vmem:[%s2327_s8 + $0x38] sm:$0xff] }
  0xb2   :  { %v1726_v50 = vpop.permute.xlu0 %268 }
  0xb3   :  { %v1728_v53 = vpop.permute.xlu1 %264 }
  0xb4   :  { %1111 = vperm.xlu0 %1340, %v1087_v47  }
  0xb5   :  { %913 = vperm.xlu1 %1337, %v1568_v38   ;;  %v1093_v38 = vld [vmem:[%s2327_s8 + $0x48] sm:$0x7f] }
  0xb6   :  { %v1734_v57 = vpop.permute.xlu0 %280 }
  0xb7   :  { %v273_v58 = vpop.permute.xlu1 %272 }
  0xb8   :  { %1121 = vperm.xlu0 %1340, %v1089_v54   ;;  %v1029_v54 = vrot.slane %v1475_v15, %v1547_v33 }
  0xb9   :  { %921 = vperm.xlu1 %1337, %v1577_v40  }
  0xba   :  { %v1740_v61 = vpop.permute.xlu0 %288 }
  0xbb   :  { %v1742_v4 = vpop.permute.xlu1 %276 }
  0xbc   :  { %1131 = vperm.xlu0 %1340, %v1091_v35  }
  0xbd   :  { %1339 = vset.pattern.permute.xlu1 %v1369_v27  ;;  %v33_v27 = vld [vmem:[%s2319_s0] sm:$0x77] }
  0xbe   :  { %987 = vperm.xlu1 %1339, %v1467_v13   ;;  %v1749_v5 = vpop.permute.xlu0 %296  ;;  %v110_v13 = vrot.slane %v33_v27, %v1754_v9  ;;  %v114_v44 = vrot.slane %v33_v27, %v1757_v22  ;;  %v200_v12 = vrot.slane %v33_v27, %v1478_v16  ;;  %v314_v35 = vrot.slane %v33_v27, %v1547_v33 }
  0xbf   :  { %v1751_v40 = vpop.permute.xlu1 %284 }
  0xc0   :  { %1141 = vperm.xlu0 %1340, %v1093_v38   ;;  %v318_v38 = vrot.slane %v33_v27, %v1541_v31  ;;  %v1780_v3 = vrot.slane %v110_v13, %v1754_v9  ;;  %v1789_v45 = vrot.slane %v200_v12, %v1478_v16 }
  0xc2   :  { %995 = vperm.xlu1 %1339, %v791_v10   ;;  %v1759_v29 = vpop.permute.xlu0 %304  ;;  %v204_v10 = vrot.slane %v33_v27, %v1470_v14  ;;  %v1797_v27 = vrot.slane %v1029_v54, %v1547_v33  ;;  %v219_v13 = vmul.f32 %v1789_v45, %v1678_v20  ;;  %v1807_v12 = vrot.slane %v318_v38, %v1547_v33 }
  0xc3   :  { %v1764_v39 = vpop.permute.xlu1 %292 }
  0xc4   :  { %v1792_v42 = vrot.slane %v204_v10, %v1478_v16  ;;  %2363 = vst [vmem:[#allocation23_spill] sm:$0xff] %v1797_v27  ;;  %v129_v10 = vmul.f32 %v1780_v3, %v1608_v48  ;;  %v334_v32 = vmul.f32 %v1807_v12, %v273_v58 }
  0xc6   :  { %999 = vperm.xlu1 %1339, %v1486_v18   ;;  %v1769_v2 = vpop.permute.xlu0 %648  ;;  %v1783_v18 = vrot.slane %v114_v44, %v1754_v9  ;;  %v220_v44 = vmul.f32 %v1792_v42, %v1678_v20  ;;  %v243_v26 = vadd.f32 %v219_v13, %v129_v10 }
  0xc7   :  { %v1773_v47 = vpop.permute.xlu1 %300 }
  0xc8   :  { %v130_v41 = vmul.f32 %v1783_v18, %v1608_v48 }
  0xca   :  { %1007 = vperm.xlu1 %1339, %v1498_v21   ;;  %v1786_v30 = vpop.permute.xlu0 %660  ;;  %v1804_v21 = vrot.slane %v314_v35, %v1547_v33  ;;  %v244_v24 = vadd.f32 %v220_v44, %v130_v41  ;;  %v545_v41 = vld [vmem:[%s2320_s1] sm:$0x77]  ;;  %v2368_v44 = vmov 0  }
  0xcb   :  { %2361 = vst [vmem:[#allocation21_spill] sm:$0xff] %v1786_v30  ;;  %v1794_v15 = vpop.permute.xlu1 %308 }
  0xcc   :  { %2362 = vst [vmem:[#allocation22_spill] sm:$0xff] %v1794_v15  ;;  %v333_v34 = vmul.f32 %v1804_v21, %v273_v58  ;;  %v358_v11 = vadd.f32 %v334_v32, %v244_v24  ;;  %v620_v32 = vrot.slane %v545_v41, %v1470_v14 }
  0xce   :  { %1015 = vperm.xlu1 %1339, %v1507_v23   ;;  %v992_v54 = vpop.permute.xlu0 %991  ;;  %v357_v58 = vadd.f32 %v333_v34, %v243_v26  ;;  %v616_v26 = vrot.slane %v545_v41, %v1478_v16 }
  0xcf   :  { %v1817_v20 = vmul.f32 %v1797_v27, %v992_v54  ;;  %v1820_v35 = vmul.f32 %v1559_v36, %v992_v54  ;;  %v1085_v54 = vld [vmem:[%s2327_s8 + $0x8] sm:$0xff] }
  0xd0   :  { %v1822_v38 = vpop.permute.xlu1 %396 }
  0xd1   :  { %2364 = vst [vmem:[#allocation24_spill] sm:$0xff] %v1817_v20  ;;  %2365 = vst [vmem:[#allocation25_spill] sm:$0xff] %v1820_v35 }
  0xd2   :  { %1023 = vperm.xlu1 %1339, %v1516_v25   ;;  %v1004_v48 = vpop.permute.xlu0 %1003 }
  0xd3   :  { %v1826_v23 = vmul.f32 %v1797_v27, %v1004_v48  ;;  %v1829_v17 = vmul.f32 %v1559_v36, %v1004_v48 }
  0xd4   :  { %v402_v19 = vpop.permute.xlu1 %401 }
  0xd5   :  { %2366 = vst [vmem:[#allocation26_spill] sm:$0xff] %v1826_v23  ;;  %2367 = vst [vmem:[#allocation27_spill] sm:$0xff] %v1829_v17  ;;  %v453_v13 = vadd.f32 %v402_v19, %v357_v58  ;;  %v454_v25 = vadd.f32 %v402_v19, %v358_v11  ;;  %v1086_v19 = vld [vmem:[%s2327_s8 + $0x10] sm:$0xff]  ;;  %v666_v11 = vrot.slane %v545_v41, %v1547_v33 }
  0xd6   :  { %1341 = vset.pattern.permute.xlu1 %v2368_v44  ;;  %v1012_v10 = vpop.permute.xlu0 %1011  ;;  %v670_v58 = vrot.slane %v545_v41, %v1541_v31  ;;  %v132_v31 = vmul.f32 %v1783_v18, %v1615_v51  ;;  %v139_v17 = vmul.f32 %v1780_v3, %v1636_v59 }
  0xd7   :  { %v477_v23 = vmax.f32 %v453_v13, 1.0  ;;  %v478_v35 = vmax.f32 %v454_v25, 1.0  ;;  %v1839_v48 = vmul.f32 %v1797_v27, %v1012_v10  ;;  %v1842_v24 = vmul.f32 %v1559_v36, %v1012_v10  ;;  %1101 = vperm.xlu1 %1341, %v1085_v54  }
  0xd8   :  { %v1846_v34 = vpop.permute.xlu1 %411  ;;  %v574_v10 = vrot.slane %v545_v41, %v1754_v9  ;;  %v578_v54 = vrot.slane %v545_v41, %v1757_v22  ;;  %v218_v22 = vmul.f32 %v1792_v42, %v1662_v7 }
  0xd9   :  { %2369 = vst [vmem:[#allocation28_spill] sm:$0xff] %v1839_v48  ;;  %2370 = vst [vmem:[#allocation29_spill] sm:$0xff] %v1842_v24  ;;  %v501_v13 = vmin.f32 %v477_v23, 0.0  ;;  %v502_v25 = vmin.f32 %v478_v35, 0.0  ;;  %v131_v48 = vmul.f32 %v1780_v3, %v1615_v51  ;;  %v221_v35 = vmul.f32 %v1789_v45, %v1617_v52 }
  0xda   :  { %v1020_v44 = vpop.permute.xlu0 %1019  ;;  %v222_v23 = vmul.f32 %v1792_v42, %v1617_v52  ;;  %v1881_v51 = vrot.slane %v666_v11, %v1547_v33  ;;  %v215_v52 = vmul.f32 %v1789_v45, %v1610_v49  ;;  %v226_v11 = vmul.f32 %v1792_v42, %v1628_v56 }
  0xdb   :  { %525 = vst [vmem:[#allocation2 + $0x20] sm:$0xff] %v501_v13  ;;  %526 = vst [vmem:[#allocation2 + $0x28] sm:$0xff] %v502_v25  ;;  %v1856_v14 = vmul.f32 %v1797_v27, %v1020_v44  ;;  %v1859_v24 = vmul.f32 %v1559_v36, %v1020_v44  ;;  %1106 = vperm.xlu1 %1341, %v1086_v19   ;;  %v1088_v13 = vld [vmem:[%s2327_s8 + $0x20] sm:$0xff]  ;;  %v1875_v19 = vrot.slane %v616_v26, %v1478_v16 }
  0xdc   :  { %v1869_v41 = vpop.permute.xlu1 %421  ;;  %v1878_v25 = vrot.slane %v620_v32, %v1478_v16  ;;  %v1884_v44 = vrot.slane %v670_v58, %v1547_v33  ;;  %v216_v36 = vmul.f32 %v1792_v42, %v1610_v49  ;;  %v1891_v27 = vrot.slane %v574_v10, %v1754_v9 }
  0xdd   :  { %2371 = vst [vmem:[#allocation30_spill] sm:$0xff] %v1856_v14  ;;  %2372 = vst [vmem:[#allocation31_spill] sm:$0xff] %v1859_v24  ;;  %v1894_v26 = vrot.slane %v578_v54, %v1754_v9  ;;  %v135_v16 = vmul.f32 %v1780_v3, %v1626_v55  ;;  %v136_v32 = vmul.f32 %v1783_v18, %v1626_v55  ;;  %v1090_v55 = vld [vmem:[%s2327_s8 + $0x30] sm:$0xff] }
  0xde   :  { %v225_v33 = vmul.f32 %v1789_v45, %v1628_v56  ;;  %v1904_v58 = vadd.f32 %v221_v35, %v131_v48  ;;  %v1906_v10 = vadd.f32 %v222_v23, %v132_v31  ;;  %v140_v56 = vmul.f32 %v1783_v18, %v1636_v59 }
  0xdf   :  { %1116 = vperm.xlu1 %1341, %v1088_v13   ;;  %v49_v49 = vpop.permute.xlu0 %48  ;;  %v229_v48 = vmul.f32 %v1789_v45, %v1638_v60  ;;  %v230_v31 = vmul.f32 %v1792_v42, %v1638_v60  ;;  %v329_v35 = vmul.f32 %v1804_v21, %v1728_v53  ;;  %v330_v23 = vmul.f32 %v1807_v12, %v1728_v53 }
  0xe0   :  { %v125_v54 = vmul.f32 %v1780_v3, %v49_v49  ;;  %v126_v24 = vmul.f32 %v1783_v18, %v49_v49  ;;  %v1910_v14 = vpop.permute.xlu1 %431  ;;  %v1927_v20 = vadd.f32 %v225_v33, %v135_v16  ;;  %v1929_v8 = vadd.f32 %v226_v11, %v136_v32 }
  0xe1   :  { %v217_v59 = vmul.f32 %v1789_v45, %v1662_v7  ;;  %v1948_v16 = vadd.f32 %v230_v31, %v140_v56  ;;  %v1952_v7 = vmul.f32 %v1780_v3, %v1644_v62  ;;  %v1956_v32 = vmul.f32 %v1783_v18, %v1644_v62 }
  0xe2   :  { %v239_v13 = vadd.f32 %v215_v52, %v125_v54  ;;  %v240_v49 = vadd.f32 %v216_v36, %v126_v24  ;;  %v1092_v36 = vld [vmem:[%s2327_s8 + $0x40] sm:$0xff]  ;;  %v1946_v52 = vadd.f32 %v229_v48, %v139_v17  ;;  %v331_v33 = vmul.f32 %v1804_v21, %v1726_v50 }
  0xe3   :  { %1126 = vperm.xlu1 %1341, %v1090_v55   ;;  %v54_v60 = vpop.permute.xlu0 %53  ;;  %v332_v11 = vmul.f32 %v1807_v12, %v1726_v50  ;;  %v1964_v17 = vmul.f32 %v1789_v45, %v1646_v63  ;;  %v1968_v56 = vmul.f32 %v1792_v42, %v1646_v63  ;;  %v223_v62 = vmul.f32 %v1789_v45, %v1687_v28 }
  0xe4   :  { %v127_v9 = vmul.f32 %v1780_v3, %v54_v60  ;;  %v128_v30 = vmul.f32 %v1783_v18, %v54_v60  ;;  %v1937_v6 = vpop.permute.xlu1 %441  ;;  %v1942_v53 = vadd.f32 %v329_v35, %v239_v13  ;;  %v1944_v24 = vadd.f32 %v330_v23, %v240_v49 }
  0xe5   :  { %v224_v48 = vmul.f32 %v1792_v42, %v1687_v28  ;;  %v227_v63 = vmul.f32 %v1789_v45, %v1697_v37  ;;  %v228_v23 = vmul.f32 %v1792_v42, %v1697_v37  ;;  %v337_v13 = vmul.f32 %v1804_v21, %v1734_v57 }
  0xe6   :  { %v241_v54 = vadd.f32 %v217_v59, %v127_v9  ;;  %v242_v55 = vadd.f32 %v218_v22, %v128_v30  ;;  %v338_v28 = vmul.f32 %v1807_v12, %v1734_v57  ;;  %v235_v37 = vmul.f32 %v1789_v45, %v1720_v46 }
  0xe7   :  { %1136 = vperm.xlu1 %1341, %v1092_v36   ;;  %v69_v31 = vpop.permute.xlu0 %68 }
  0xe8   :  { %v355_v35 = vadd.f32 %v331_v33, %v241_v54  ;;  %v356_v50 = vadd.f32 %v332_v11, %v242_v55  ;;  %v133_v30 = vmul.f32 %v1780_v3, %v69_v31  ;;  %v134_v9 = vmul.f32 %v1783_v18, %v69_v31  ;;  %v1976_v22 = vpop.permute.xlu1 %552 }
  0xe9   :  { %v231_v33 = vmul.f32 %v1789_v45, %v1708_v43  ;;  %v232_v11 = vmul.f32 %v1792_v42, %v1708_v43  ;;  %v236_v54 = vmul.f32 %v1792_v42, %v1720_v46 }
  0xea   :  { %v451_v49 = vadd.f32 %v1822_v38, %v355_v35  ;;  %v452_v59 = vadd.f32 %v1822_v38, %v356_v50  ;;  %v247_v60 = vadd.f32 %v223_v62, %v133_v30  ;;  %v248_v36 = vadd.f32 %v224_v48, %v134_v9 }
  0xeb   :  { %v79_v55 = vpop.permute.xlu0 %78  ;;  %v341_v62 = vmul.f32 %v1804_v21, %v1740_v61  ;;  %v342_v48 = vmul.f32 %v1807_v12, %v1740_v61 }
  0xec   :  { %v475_v57 = vmax.f32 %v451_v49, 1.0  ;;  %v476_v31 = vmax.f32 %v452_v59, 1.0  ;;  %v361_v35 = vadd.f32 %v337_v13, %v247_v60  ;;  %v362_v15 = vadd.f32 %v338_v28, %v248_v36  ;;  %v1996_v38 = vpop.permute.xlu1 %562 }
  0xed   :  { %2373 = vst [vmem:[#allocation32_spill] sm:$0xff] %v1996_v38  ;;  %v137_v43 = vmul.f32 %v1780_v3, %v79_v55  ;;  %v138_v50 = vmul.f32 %v1783_v18, %v79_v55  ;;  %v335_v13 = vmul.f32 %v1804_v21, %v1742_v4  ;;  %v336_v28 = vmul.f32 %v1807_v12, %v1742_v4 }
  0xee   :  { %v499_v30 = vmin.f32 %v475_v57, 0.0  ;;  %v500_v9 = vmin.f32 %v476_v31, 0.0  ;;  %v457_v46 = vadd.f32 %v1846_v34, %v361_v35  ;;  %v458_v49 = vadd.f32 %v1846_v34, %v362_v15 }
  0xef   :  { %v251_v59 = vadd.f32 %v227_v63, %v137_v43  ;;  %v252_v60 = vadd.f32 %v228_v23, %v138_v50  ;;  %v89_v36 = vpop.permute.xlu0 %88  ;;  %v345_v15 = vmul.f32 %v1804_v21, %v1749_v5  ;;  %v346_v34 = vmul.f32 %v1807_v12, %v1749_v5 }
  0xf0   :  { %523 = vst [vmem:[#allocation2 + $0x10] sm:$0xff] %v499_v30  ;;  %524 = vst [vmem:[#allocation2 + $0x18] sm:$0xff] %v500_v9  ;;  %v481_v61 = vmax.f32 %v457_v46, 1.0  ;;  %v482_v38 = vmax.f32 %v458_v49, 1.0  ;;  %v141_v55 = vmul.f32 %v1780_v3, %v89_v36  ;;  %v142_v57 = vmul.f32 %v1783_v18, %v89_v36 }
  0xf1   :  { %v365_v31 = vadd.f32 %v341_v62, %v251_v59  ;;  %v366_v35 = vadd.f32 %v342_v48, %v252_v60  ;;  %v599_v4 = vpop.permute.xlu1 %598  ;;  %v339_v30 = vmul.f32 %v1804_v21, %v1751_v40  ;;  %v340_v9 = vmul.f32 %v1807_v12, %v1751_v40 }
  0xf2   :  { %v505_v63 = vmin.f32 %v481_v61, 0.0  ;;  %v506_v23 = vmin.f32 %v482_v38, 0.0  ;;  %v255_v43 = vadd.f32 %v231_v33, %v141_v55  ;;  %v256_v50 = vadd.f32 %v232_v11, %v142_v57 }
  0xf3   :  { %v461_v46 = vadd.f32 %v1869_v41, %v365_v31  ;;  %v462_v49 = vadd.f32 %v1869_v41, %v366_v35  ;;  %v99_v36 = vpop.permute.xlu0 %98  ;;  %v349_v11 = vmul.f32 %v1804_v21, %v1759_v29  ;;  %v350_v38 = vmul.f32 %v1807_v12, %v1759_v29 }
  0xf4   :  { %529 = vst [vmem:[#allocation2 + $0x40] sm:$0xff] %v505_v63  ;;  %530 = vst [vmem:[#allocation2 + $0x48] sm:$0xff] %v506_v23  ;;  %v369_v5 = vadd.f32 %v345_v15, %v255_v43  ;;  %v370_v62 = vadd.f32 %v346_v34, %v256_v50  ;;  %v145_v48 = vmul.f32 %v1780_v3, %v99_v36 }
  0xf5   :  { %v146_v33 = vmul.f32 %v1783_v18, %v99_v36  ;;  %v485_v40 = vmax.f32 %v461_v46, 1.0  ;;  %v486_v59 = vmax.f32 %v462_v49, 1.0  ;;  %v2028_v60 = vpop.permute.xlu1 %606  ;;  %v359_v35 = vadd.f32 %v335_v13, %v1904_v58 }
  0xf6   :  { %v465_v41 = vadd.f32 %v1910_v14, %v369_v5  ;;  %v466_v61 = vadd.f32 %v1910_v14, %v370_v62  ;;  %v259_v55 = vadd.f32 %v235_v37, %v145_v48  ;;  %v360_v63 = vadd.f32 %v336_v28, %v1906_v10 }
  0xf7   :  { %v260_v57 = vadd.f32 %v236_v54, %v146_v33  ;;  %v509_v15 = vmin.f32 %v485_v40, 0.0  ;;  %v510_v34 = vmin.f32 %v486_v59, 0.0  ;;  %v392_v31 = vpop.permute.xlu0 %391  ;;  %v363_v37 = vadd.f32 %v339_v30, %v1927_v20 }
  0xf8   :  { %v489_v23 = vmax.f32 %v465_v41, 1.0  ;;  %v490_v43 = vmax.f32 %v466_v61, 1.0  ;;  %v373_v29 = vadd.f32 %v349_v11, %v259_v55  ;;  %v449_v46 = vadd.f32 %v392_v31, %v1942_v53 }
  0xf9   :  { %v374_v50 = vadd.f32 %v350_v38, %v260_v57  ;;  %533 = vst [vmem:[#allocation2 + $0x60] sm:$0xff] %v509_v15  ;;  %534 = vst [vmem:[#allocation2 + $0x68] sm:$0xff] %v510_v34  ;;  %v450_v49 = vadd.f32 %v392_v31, %v1944_v24  ;;  %v2036_v14 = vpop.permute.xlu1 %610  ;;  %v364_v54 = vadd.f32 %v340_v9, %v1929_v8 }
  0xfa   :  { %v513_v36 = vmin.f32 %v489_v23, 0.0  ;;  %v514_v58 = vmin.f32 %v490_v43, 0.0  ;;  %v469_v10 = vadd.f32 %v1937_v6, %v373_v29  ;;  %v343_v28 = vmul.f32 %v1804_v21, %v1764_v39 }
  0xfb   :  { %v470_v13 = vadd.f32 %v1937_v6, %v374_v50  ;;  %v344_v53 = vmul.f32 %v1807_v12, %v1764_v39  ;;  %v473_v5 = vmax.f32 %v449_v46, 1.0  ;;  %v474_v24 = vmax.f32 %v450_v49, 1.0  ;;  %v407_v62 = vpop.permute.xlu0 %406 }
  0xfc   :  { %537 = vst [vmem:[#allocation2 + $0x80] sm:$0xff] %v513_v36  ;;  %538 = vst [vmem:[#allocation2 + $0x88] sm:$0xff] %v514_v58  ;;  %v493_v20 = vmax.f32 %v469_v10, 1.0  ;;  %v455_v8 = vadd.f32 %v407_v62, %v359_v35  ;;  %v456_v9 = vadd.f32 %v407_v62, %v360_v63  ;;  %v631_v48 = vmul.f32 %v1875_v19, %v599_v4 }
  0xfd   :  { %v494_v30 = vmax.f32 %v470_v13, 1.0  ;;  %v632_v33 = vmul.f32 %v1878_v25, %v599_v4  ;;  %v497_v6 = vmin.f32 %v473_v5, 0.0  ;;  %v498_v11 = vmin.f32 %v474_v24, 0.0  ;;  %v2374_v13 = vld [vmem:[#allocation22_spill] sm:$0xff] }
  0xfe   :  { %v517_v38 = vmin.f32 %v493_v20, 0.0  ;;  %v479_v59 = vmax.f32 %v455_v8, 1.0  ;;  %v480_v41 = vmax.f32 %v456_v9, 1.0  ;;  %v2048_v39 = vpop.permute.xlu1 %652  ;;  %v147_v61 = vmul.f32 %v1780_v3, %v1650_v0 }
  0xff   :  { %v518_v40 = vmin.f32 %v494_v30, 0.0  ;;  %v148_v55 = vmul.f32 %v1783_v18, %v1650_v0  ;;  %v589_v57 = vmul.f32 %v1891_v27, %v1976_v22  ;;  %v590_v4 = vmul.f32 %v1894_v26, %v1976_v22  ;;  %521 = vst [vmem:[#allocation2] sm:$0xff] %v497_v6  ;;  %522 = vst [vmem:[#allocation2 + $0x8] sm:$0xff] %v498_v11  ;;  %v417_v15 = vpop.permute.xlu0 %416  ;;  %v2375_v11 = vld [vmem:[#allocation32_spill] sm:$0xff] }
 0x100   :  { %541 = vst [vmem:[#allocation2 + $0xa0] sm:$0xff] %v517_v38  ;;  %v503_v34 = vmin.f32 %v479_v59, 0.0  ;;  %v504_v31 = vmin.f32 %v480_v41, 0.0  ;;  %v459_v35 = vadd.f32 %v417_v15, %v363_v37  ;;  %v460_v63 = vadd.f32 %v417_v15, %v364_v54 }
 0x101   :  { %542 = vst [vmem:[#allocation2 + $0xa8] sm:$0xff] %v518_v40  ;;  %v237_v3 = vmul.f32 %v1789_v45, %v1652_v1  ;;  %v238_v0 = vmul.f32 %v1792_v42, %v1652_v1  ;;  %v367_v18 = vadd.f32 %v343_v28, %v1946_v52  ;;  %v368_v23 = vadd.f32 %v344_v53, %v1948_v16 }
 0x102   :  { %v639_v22 = vadd.f32 %v631_v48, %v589_v57  ;;  %v640_v43 = vadd.f32 %v632_v33, %v590_v4  ;;  %527 = vst [vmem:[#allocation2 + $0x30] sm:$0xff] %v503_v34  ;;  %528 = vst [vmem:[#allocation2 + $0x38] sm:$0xff] %v504_v31  ;;  %v483_v29 = vmax.f32 %v459_v35, 1.0  ;;  %v484_v50 = vmax.f32 %v460_v63, 1.0  ;;  %v657_v46 = vpop.permute.xlu1 %656 }
 0x103   :  { %v681_v49 = vmul.f32 %v1881_v51, %v1769_v2  ;;  %v682_v45 = vmul.f32 %v1884_v44, %v1769_v2  ;;  %v347_v1 = vmul.f32 %v1804_v21, %v1773_v47  ;;  %v348_v42 = vmul.f32 %v1807_v12, %v1773_v47  ;;  %v427_v52 = vpop.permute.xlu0 %426 }
 0x104   :  { %v507_v16 = vmin.f32 %v483_v29, 0.0  ;;  %v508_v37 = vmin.f32 %v484_v50, 0.0  ;;  %v463_v54 = vadd.f32 %v427_v52, %v367_v18  ;;  %v464_v36 = vadd.f32 %v427_v52, %v368_v23 }
 0x105   :  { %v257_v58 = vadd.f32 %v1964_v17, %v1952_v7  ;;  %v258_v10 = vadd.f32 %v1968_v56, %v1956_v32  ;;  %v351_v2 = vmul.f32 %v1804_v21, %v2374_v13  ;;  %v352_v28 = vmul.f32 %v1807_v12, %v2374_v13 }
 0x106   :  { %531 = vst [vmem:[#allocation2 + $0x50] sm:$0xff] %v507_v16  ;;  %532 = vst [vmem:[#allocation2 + $0x58] sm:$0xff] %v508_v37  ;;  %v487_v47 = vmax.f32 %v463_v54, 1.0  ;;  %v488_v53 = vmax.f32 %v464_v36, 1.0  ;;  %v689_v5 = vadd.f32 %v681_v49, %v639_v22  ;;  %v690_v24 = vadd.f32 %v682_v45, %v640_v43 }
 0x107   :  { %v261_v62 = vadd.f32 %v237_v3, %v147_v61  ;;  %v262_v20 = vadd.f32 %v238_v0, %v148_v55  ;;  %v704_v30 = vpop.permute.xlu1 %703  ;;  %v437_v8 = vpop.permute.xlu0 %436  ;;  %v371_v7 = vadd.f32 %v347_v1, %v257_v58  ;;  %v372_v17 = vadd.f32 %v348_v42, %v258_v10  ;;  %v2376_v42 = vld [vmem:[#allocation7_spill] sm:$0xff] }
 0x108   :  { %v511_v9 = vmin.f32 %v487_v47, 0.0  ;;  %v512_v32 = vmin.f32 %v488_v53, 0.0  ;;  %v721_v56 = vadd.f32 %v704_v30, %v689_v5  ;;  %v722_v48 = vadd.f32 %v704_v30, %v690_v24 }
 0x109   :  { %v467_v21 = vadd.f32 %v437_v8, %v371_v7  ;;  %v468_v33 = vadd.f32 %v437_v8, %v372_v17  ;;  %v375_v6 = vadd.f32 %v351_v2, %v261_v62  ;;  %v376_v12 = vadd.f32 %v352_v28, %v262_v20 }
 0x10a   :  { %v593_v38 = vmul.f32 %v1891_v27, %v2375_v11  ;;  %v594_v40 = vmul.f32 %v1894_v26, %v2375_v11  ;;  %535 = vst [vmem:[#allocation2 + $0x70] sm:$0xff] %v511_v9  ;;  %536 = vst [vmem:[#allocation2 + $0x78] sm:$0xff] %v512_v32  ;;  %v729_v59 = vmax.f32 %v721_v56, 1.0  ;;  %v730_v41 = vmax.f32 %v722_v48, 1.0  ;;  %v2377_v9 = vld [vmem:[#allocation21_spill] sm:$0xff] }
 0x10b   :  { %v635_v61 = vmul.f32 %v1875_v19, %v2028_v60  ;;  %v636_v55 = vmul.f32 %v1878_v25, %v2028_v60  ;;  %v491_v57 = vmax.f32 %v467_v21, 1.0  ;;  %v492_v4 = vmax.f32 %v468_v33, 1.0  ;;  %v714_v15 = vpop.permute.xlu1 %713  ;;  %v447_v34 = vpop.permute.xlu0 %446 }
 0x10c   :  { %v685_v31 = vmul.f32 %v1881_v51, %v657_v46  ;;  %v686_v35 = vmul.f32 %v1884_v44, %v657_v46  ;;  %v2090_v63 = vmin.f32 %v729_v59, 0.0  ;;  %v2092_v3 = vmin.f32 %v730_v41, 0.0 }
 0x10d   :  { %v515_v0 = vmin.f32 %v491_v57, 0.0  ;;  %v516_v18 = vmin.f32 %v492_v4, 0.0  ;;  %v471_v23 = vadd.f32 %v447_v34, %v375_v6  ;;  %v472_v22 = vadd.f32 %v447_v34, %v376_v12 }
 0x10e   :  { %v754_v43 = vrot.slane %v2090_v63, 2  ;;  %v755_v60 = vrot.slane %v2092_v3, 2  ;;  %v643_v29 = vadd.f32 %v635_v61, %v593_v38  ;;  %v644_v50 = vadd.f32 %v636_v55, %v594_v40 }
 0x10f   :  { %539 = vst [vmem:[#allocation2 + $0x90] sm:$0xff] %v515_v0  ;;  %540 = vst [vmem:[#allocation2 + $0x98] sm:$0xff] %v516_v18  ;;  %v495_v49 = vmax.f32 %v471_v23, 1.0  ;;  %v496_v45 = vmax.f32 %v472_v22, 1.0  ;;  %v719_v1 = vpop.permute.xlu1 %718  ;;  %v558_v46 = vpop.permute.xlu0 %557  ;;  %v633_v52 = vmul.f32 %v1875_v19, %v2376_v42  ;;  %v634_v16 = vmul.f32 %v1878_v25, %v2376_v42 }
 0x110   :  { %778 = vst [vmem:[#allocation2 + $0xb0] sm:$0xc0] %v754_v43  ;;  %779 = vst [vmem:[#allocation2 + $0xb8] sm:$0xc0] %v755_v60  ;;  %v591_v37 = vmul.f32 %v1891_v27, %v558_v46  ;;  %v592_v54 = vmul.f32 %v1894_v26, %v558_v46  ;;  %v693_v36 = vadd.f32 %v685_v31, %v643_v29 }
 0x111   :  { %v694_v58 = vadd.f32 %v686_v35, %v644_v50  ;;  %v519_v10 = vmin.f32 %v495_v49, 0.0  ;;  %v520_v13 = vmin.f32 %v496_v45, 0.0  ;;  %v637_v62 = vmul.f32 %v1875_v19, %v2036_v14  ;;  %v1342_v50 = vld [vmem:[%s2321_s2] sm:$0x77]  ;;  %v2378_v49 = vld [vmem:[#allocation19_spill] sm:$0xff]  ;;  %s1370_s2 = smov [#allocation2]  }
 0x112   :  { %v725_v2 = vadd.f32 %v714_v15, %v693_v36  ;;  %v641_v47 = vadd.f32 %v633_v52, %v591_v37  ;;  %v642_v53 = vadd.f32 %v634_v16, %v592_v54  ;;  %v638_v20 = vmul.f32 %v1878_v25, %v2036_v14  ;;  %s1312_s25 = sshll.u32 %s1370_s2, 4  ;;  %s1313_s25 = int_to_ptr.vmem [resolvable:$true] %s1312_s25 }
 0x113   :  { %v726_v28 = vadd.f32 %v714_v15, %v694_v58  ;;  %543 = vst [vmem:[#allocation2 + $0xb0] sm:$0x3f] %v519_v10  ;;  %544 = vst [vmem:[#allocation2 + $0xb8] sm:$0x3f] %v520_v13  ;;  %v2106_v5 = vpop.permute.xlu1 %806  ;;  %v568_v24 = vpop.permute.xlu0 %567  ;;  %v683_v7 = vmul.f32 %v1881_v51, %v2048_v39  ;;  %v684_v17 = vmul.f32 %v1884_v44, %v2048_v39  ;;  %s1343_s3 = scalar_lea.vmem %s1313_s25, 6656  ;;  %p1348_p1 = scmp.lt.s32.totalorder %s1313_s25, %s1313_s25 }
 0x114   :  { %v595_v30 = vmul.f32 %v1891_v27, %v568_v24  ;;  %v596_v8 = vmul.f32 %v1894_v26, %v568_v24  ;;  %v687_v32 = vmul.f32 %v1881_v51, %v2377_v9  ;;  %v688_v56 = vmul.f32 %v1884_v44, %v2377_v9  ;;  %p1344_p0 = scmp.ne.s32.totalorder %s1313_s25, %s1343_s3  ;;  %p1349_p2 = scmp.lt.s32.totalorder %s1343_s3, %s1343_s3 }
 0x115   :  { %v733_v21 = vmax.f32 %v725_v2, 1.0  ;;  %v734_v25 = vmax.f32 %v726_v28, 1.0  ;;  %v691_v27 = vadd.f32 %v683_v7, %v641_v47  ;;  %v692_v26 = vadd.f32 %v684_v17, %v642_v53  ;;  %v2380_v53 = vld [vmem:[#allocation8_spill] sm:$0xff] }
 0x116   :  { %v645_v19 = vadd.f32 %v637_v62, %v595_v30  ;;  %v646_v48 = vadd.f32 %v638_v20, %v596_v8  ;;  %v853_v45 = vrot.slane %v1342_v50, %v2378_v49  ;;  %v2381_v62 = vld [vmem:[#allocation5_spill] sm:$0xff]  ;;  %v2382_v17 = vld [vmem:[#allocation24_spill] sm:$0xff]  ;;  %p1350_p3 = por %p1349_p2, %p1348_p1 }
 0x117   :  { %v2122_v14 = vpop.permute.xlu1 %816  ;;  %v709_v33 = vpop.permute.xlu0 %708  ;;  %v741_v59 = vmin.f32 %v733_v21, 0.0  ;;  %v742_v51 = vmin.f32 %v734_v25, 0.0 }
 0x118   :  { %v695_v6 = vadd.f32 %v687_v32, %v645_v19  ;;  %v696_v12 = vadd.f32 %v688_v56, %v646_v48  ;;  %v723_v11 = vadd.f32 %v709_v33, %v691_v27  ;;  %v724_v38 = vadd.f32 %v709_v33, %v692_v26  ;;  %v2383_v32 = vld [vmem:[#allocation25_spill] sm:$0xff]  ;;  %p1351_p4 = pnand %p1350_p3, %p1344_p0 }
 0x119   :  { %v760_v0 = vrot.slane %v741_v59, 2  ;;  %v762_v18 = vrot.slane %v742_v51, 2  ;;  %v2384_v59 = vld [vmem:[#allocation26_spill] sm:$0xff] }
 0x11a   :  { %v727_v39 = vadd.f32 %v719_v1, %v695_v6  ;;  %v728_v40 = vadd.f32 %v719_v1, %v696_v12  ;;  %v731_v41 = vmax.f32 %v723_v11, 1.0  ;;  %v732_v61 = vmax.f32 %v724_v38, 1.0  ;;  %v2379_v1 = vld [vmem:[#allocation20_spill] sm:$0xff] }
 0x11b   :  { %v2124_v44 = vpop.permute.xlu1 %826  ;;  %v2126_v34 = vpop.permute.xlu0 %801  ;;  %v857_v46 = vrot.slane %v1342_v50, %v2379_v1 }
 0x11c   :  { %v735_v55 = vmax.f32 %v727_v39, 1.0  ;;  %v736_v57 = vmax.f32 %v728_v40, 1.0  ;;  %v739_v4 = vmin.f32 %v731_v41, 0.0  ;;  %v740_v15 = vmin.f32 %v732_v61, 0.0  ;;  %v2385_v41 = vld [vmem:[#allocation27_spill] sm:$0xff] }
 0x11e   :  { %v743_v31 = vmin.f32 %v735_v55, 0.0  ;;  %v744_v35 = vmin.f32 %v736_v57, 0.0  ;;  %v756_v23 = vrot.slane %v739_v4, 2  ;;  %v758_v22 = vrot.slane %v740_v15, 2 }
 0x11f   :  { %v2128_v29 = vpop.permute.xlu1 %836  ;;  %v812_v63 = vpop.permute.xlu0 %811 }
 0x120   :  { %v764_v42 = vrot.slane %v743_v31, 2  ;;  %v766_v52 = vrot.slane %v744_v35, 2  ;;  %v757_v16 = vsel %vm753_vm0, %v754_v43, %v756_v23  ;;  %v759_v37 = vsel %vm753_vm0, %v755_v60, %v758_v22 }
 0x121   :  { %v761_v54 = vsel %vm753_vm0, %v756_v23, %v760_v0  ;;  %v763_v36 = vsel %vm753_vm0, %v758_v22, %v762_v18  ;;  %780 = vst [vmem:[#allocation2 + $0xc0] sm:$0xff] %v757_v16  ;;  %781 = vst [vmem:[#allocation2 + $0xc8] sm:$0xff] %v759_v37  ;;  %v2148_v43 = vrot.slane %v853_v45, %v2378_v49  ;;  %v2387_v22 = vld [vmem:[#allocation29_spill] sm:$0xff] }
 0x122   :  { %v765_v58 = vsel %vm753_vm0, %v760_v0, %v764_v42  ;;  %v767_v10 = vsel %vm753_vm0, %v762_v18, %v766_v52  ;;  %786 = vst [vmem:[#allocation2 + $0xf0] sm:$0xf] %v764_v42  ;;  %787 = vst [vmem:[#allocation2 + $0xf8] sm:$0xf] %v766_v52  ;;  %v2151_v60 = vrot.slane %v857_v46, %v2378_v49  ;;  %v2386_v18 = vld [vmem:[#allocation28_spill] sm:$0xff] }
 0x123   :  { %782 = vst [vmem:[#allocation2 + $0xd0] sm:$0xff] %v761_v54  ;;  %783 = vst [vmem:[#allocation2 + $0xd8] sm:$0xff] %v763_v36  ;;  %v2145_v3 = vpop.permute.xlu1 %846  ;;  %v870_v2 = vmul.f32 %v2148_v43, %v2106_v5  ;;  %v822_v47 = vpop.permute.xlu0 %821  ;;  %v868_v49 = vmul.f32 %v2148_v43, %v2126_v34  ;;  %v2388_v54 = vld [vmem:[#allocation30_spill] sm:$0xff] }
 0x124   :  { %784 = vst [vmem:[#allocation2 + $0xe0] sm:$0xff] %v765_v58  ;;  %785 = vst [vmem:[#allocation2 + $0xe8] sm:$0xff] %v767_v10  ;;  %v871_v28 = vmul.f32 %v2151_v60, %v2106_v5  ;;  %v876_v21 = vmul.f32 %v2148_v43, %v822_v47  ;;  %v877_v5 = vmul.f32 %v2151_v60, %v822_v47  ;;  %v2389_v58 = vld [vmem:[#allocation31_spill] sm:$0xff] }
 0x125   :  { %v869_v45 = vmul.f32 %v2151_v60, %v2126_v34 }
 0x127   :  { %v832_v19 = vpop.permute.xlu0 %831 }
 0x128   :  { %v894_v13 = vpop.permute.xlu1 %893  ;;  %v880_v6 = vmul.f32 %v2148_v43, %v832_v19  ;;  %v881_v12 = vmul.f32 %v2151_v60, %v832_v19 }
 0x129   :  { %v948_v24 = vmul.f32 %v2380_v53, %v894_v13  ;;  %v949_v20 = vmul.f32 %v2381_v62, %v894_v13  ;;  %v2390_v13 = vld [vmem:[#allocation9_spill] sm:$0xff] }
 0x12b   :  { %v968_v30 = vadd.f32 %v948_v24, %v870_v2  ;;  %v969_v8 = vadd.f32 %v949_v20, %v871_v28  ;;  %v842_v38 = vpop.permute.xlu0 %841  ;;  %v966_v2 = vadd.f32 %v2390_v13, %v868_v49  ;;  %v2391_v28 = vld [vmem:[#allocation10_spill] sm:$0xff]  ;;  %v2392_v24 = vld [vmem:[#allocation23_spill] sm:$0xff] }
 0x12c   :  { %v898_v7 = vpop.permute.xlu1 %897  ;;  %v884_v4 = vmul.f32 %v2148_v43, %v842_v38  ;;  %v885_v15 = vmul.f32 %v2151_v60, %v842_v38  ;;  %v967_v47 = vadd.f32 %v2391_v28, %v869_v45  ;;  %v2393_v20 = vld [vmem:[#allocation6_spill] sm:$0xff]  ;;  %v2394_v38 = vld [vmem:[#allocation11_spill] sm:$0xff]  ;;  %v886_v28 = vmul.f32 %v2148_v43, %v2145_v3 }
 0x12d   :  { %v2160_v9 = vadd.f32 %v2382_v17, %v968_v30  ;;  %v2163_v56 = vadd.f32 %v2383_v32, %v969_v8  ;;  %v950_v42 = vmul.f32 %v2380_v53, %v898_v7  ;;  %v951_v52 = vmul.f32 %v2381_v62, %v898_v7 }
 0x12e   :  { %v874_v17 = vmul.f32 %v2148_v43, %v2122_v14  ;;  %v875_v32 = vmul.f32 %v2151_v60, %v2122_v14 }
 0x12f   :  { %v1097_v16 = vpop.permute.xlu0 %1096 }
 0x130   :  { %v906_v48 = vpop.permute.xlu1 %905 }
 0x131   :  { %v954_v25 = vmul.f32 %v2380_v53, %v906_v48  ;;  %v955_v27 = vmul.f32 %v2381_v62, %v906_v48 }
 0x133   :  { %v974_v26 = vadd.f32 %v954_v25, %v876_v21  ;;  %v975_v33 = vadd.f32 %v955_v27, %v877_v5 }
 0x134   :  { %v914_v11 = vpop.permute.xlu1 %913 }
 0x135   :  { %v958_v39 = vmul.f32 %v2380_v53, %v914_v11  ;;  %v959_v40 = vmul.f32 %v2381_v62, %v914_v11  ;;  %v2174_v51 = vadd.f32 %v2384_v59, %v974_v26  ;;  %v2177_v61 = vadd.f32 %v2385_v41, %v975_v33  ;;  %v1112_v33 = vpop.permute.xlu0 %1111 }
 0x136   :  { %v878_v59 = vmul.f32 %v2148_v43, %v2124_v44  ;;  %v879_v41 = vmul.f32 %v2151_v60, %v2124_v44  ;;  %v2397_v44 = vld [vmem:[#allocation14_spill] sm:$0xff] }
 0x137   :  { %v978_v55 = vadd.f32 %v958_v39, %v880_v6  ;;  %v979_v57 = vadd.f32 %v959_v40, %v881_v12  ;;  %v972_v39 = vadd.f32 %v2394_v38, %v874_v17  ;;  %v2395_v40 = vld [vmem:[#allocation12_spill] sm:$0xff] }
 0x138   :  { %v922_v31 = vpop.permute.xlu1 %921  ;;  %v973_v14 = vadd.f32 %v2395_v40, %v875_v32 }
 0x139   :  { %v962_v35 = vmul.f32 %v2380_v53, %v922_v31  ;;  %v963_v0 = vmul.f32 %v2381_v62, %v922_v31  ;;  %v2184_v23 = vadd.f32 %v2386_v18, %v978_v55  ;;  %v2187_v50 = vadd.f32 %v2387_v22, %v979_v57  ;;  %v1122_v49 = vpop.permute.xlu0 %1121 }
 0x13a   :  { %v872_v53 = vmul.f32 %v2148_v43, %v812_v63  ;;  %v873_v62 = vmul.f32 %v2151_v60, %v812_v63 }
 0x13b   :  { %v982_v1 = vadd.f32 %v962_v35, %v884_v4  ;;  %v983_v46 = vadd.f32 %v963_v0, %v885_v15 }
 0x13c   :  { %v970_v19 = vadd.f32 %v950_v42, %v872_v53  ;;  %v971_v48 = vadd.f32 %v951_v52, %v873_v62  ;;  %v977_v42 = vadd.f32 %v2397_v44, %v879_v41  ;;  %v2399_v53 = vld [vmem:[#allocation16_spill] sm:$0xff] }
 0x13d   :  { %v988_v37 = vpop.permute.xlu1 %987  ;;  %v2196_v36 = vadd.f32 %v2388_v54, %v982_v1  ;;  %v2199_v10 = vadd.f32 %v2389_v58, %v983_v46  ;;  %v2396_v1 = vld [vmem:[#allocation13_spill] sm:$0xff]  ;;  %v883_v54 = vmul.f32 %v2151_v60, %v2128_v29 }
 0x13e   :  { %v1044_v34 = vmul.f32 %v2392_v24, %v988_v37  ;;  %v1045_v30 = vmul.f32 %v2393_v20, %v988_v37  ;;  %v976_v46 = vadd.f32 %v2396_v1, %v878_v59  ;;  %v882_v37 = vmul.f32 %v2148_v43, %v2128_v29  ;;  %v2401_v43 = vld [vmem:[#allocation18_spill] sm:$0xff] }
 0x13f   :  { %v981_v62 = vadd.f32 %v2399_v53, %v883_v54 }
 0x140   :  { %v1064_v8 = vadd.f32 %v1044_v34, %v966_v2  ;;  %v1065_v7 = vadd.f32 %v1045_v30, %v967_v47  ;;  %v887_v47 = vmul.f32 %v2151_v60, %v2145_v3  ;;  %v2398_v34 = vld [vmem:[#allocation15_spill] sm:$0xff] }
 0x141   :  { %v996_v21 = vpop.permute.xlu1 %995  ;;  %v980_v30 = vadd.f32 %v2398_v34, %v882_v37 }
 0x142   :  { %v1144_v5 = vadd.f32 %v1097_v16, %v1064_v8  ;;  %v1145_v25 = vadd.f32 %v1097_v16, %v1065_v7  ;;  %v1048_v27 = vmul.f32 %v2392_v24, %v996_v21  ;;  %v1049_v26 = vmul.f32 %v2393_v20, %v996_v21  ;;  %v1132_v8 = vpop.permute.xlu0 %1131 }
 0x144   :  { %v1164_v6 = vmax.f32 %v1144_v5, 1.0  ;;  %v1165_v63 = vmax.f32 %v1145_v25, 1.0  ;;  %v2213_v12 = vadd.f32 %v1048_v27, %v970_v19  ;;  %v2215_v11 = vadd.f32 %v1049_v26, %v971_v48  ;;  %v2400_v5 = vld [vmem:[#allocation17_spill] sm:$0xff] }
 0x145   :  { %v1000_v55 = vpop.permute.xlu1 %999  ;;  %v984_v25 = vadd.f32 %v2400_v5, %v886_v28  ;;  %v985_v27 = vadd.f32 %v2401_v43, %v887_v47 }
 0x146   :  { %v2223_v57 = vmin.f32 %v1164_v6, 0.0  ;;  %v2225_v4 = vmin.f32 %v1165_v63, 0.0  ;;  %v1050_v15 = vmul.f32 %v2392_v24, %v1000_v55  ;;  %v1051_v31 = vmul.f32 %v2393_v20, %v1000_v55  ;;  %v1142_v63 = vpop.permute.xlu0 %1141 }
 0x148   :  { %v1225_v35 = vrot.slane %v2223_v57, 4  ;;  %v1226_v0 = vrot.slane %v2225_v4, 4  ;;  %v1070_v18 = vadd.f32 %v1050_v15, %v972_v39  ;;  %v1071_v22 = vadd.f32 %v1051_v31, %v973_v14 }
 0x149   :  { %v1008_v45 = vpop.permute.xlu1 %1007 }
 0x14a   :  { %1285 = vst [vmem:[#allocation2 + $0xf0] sm:$0xf0] %v1225_v35  ;;  %1286 = vst [vmem:[#allocation2 + $0xf8] sm:$0xf0] %v1226_v0  ;;  %v1054_v52 = vmul.f32 %v2392_v24, %v1008_v45  ;;  %v1055_v16 = vmul.f32 %v2393_v20, %v1008_v45  ;;  %v1150_v32 = vadd.f32 %v1112_v33, %v1070_v18 }
 0x14b   :  { %v1151_v29 = vadd.f32 %v1112_v33, %v1071_v22 }
 0x14c   :  { %v1074_v58 = vadd.f32 %v1054_v52, %v976_v46  ;;  %v1075_v13 = vadd.f32 %v1055_v16, %v977_v42  ;;  %v1170_v38 = vmax.f32 %v1150_v32, 1.0 }
 0x14d   :  { %v1016_v2 = vpop.permute.xlu1 %1015  ;;  %v1171_v39 = vmax.f32 %v1151_v29, 1.0 }
 0x14e   :  { %v1058_v7 = vmul.f32 %v2392_v24, %v1016_v2  ;;  %v1059_v17 = vmul.f32 %v2393_v20, %v1016_v2  ;;  %v1154_v40 = vadd.f32 %v1122_v49, %v1074_v58  ;;  %v1155_v14 = vadd.f32 %v1122_v49, %v1075_v13 }
 0x150   :  { %v1078_v19 = vadd.f32 %v1058_v7, %v980_v30  ;;  %v1079_v48 = vadd.f32 %v1059_v17, %v981_v62  ;;  %v1174_v1 = vmax.f32 %v1154_v40, 1.0  ;;  %v1175_v46 = vmax.f32 %v1155_v14, 1.0 }
 0x151   :  { %v1024_v21 = vpop.permute.xlu1 %1023 }
 0x152   :  { %v1062_v3 = vmul.f32 %v2392_v24, %v1024_v21  ;;  %v1063_v60 = vmul.f32 %v2393_v20, %v1024_v21  ;;  %v2257_v24 = vmin.f32 %v1170_v38, 0.0  ;;  %v2259_v20 = vmin.f32 %v1171_v39, 0.0 }
 0x153   :  { %v1158_v37 = vadd.f32 %v1132_v8, %v1078_v19  ;;  %v1159_v54 = vadd.f32 %v1132_v8, %v1079_v48  ;;  %v1194_v17 = vmin.f32 %v1174_v1, 0.0  ;;  %v1195_v32 = vmin.f32 %v1175_v46, 0.0 }
 0x154   :  { %v1082_v26 = vadd.f32 %v1062_v3, %v984_v25  ;;  %v1083_v6 = vadd.f32 %v1063_v60, %v985_v27  ;;  %v1235_v30 = vrot.slane %v2257_v24, 4  ;;  %v1237_v53 = vrot.slane %v2259_v20, 4 }
 0x155   :  { %v1178_v48 = vmax.f32 %v1158_v37, 1.0  ;;  %v1179_v21 = vmax.f32 %v1159_v54, 1.0 }
 0x156   :  { %v1162_v59 = vadd.f32 %v1142_v63, %v1082_v26  ;;  %v1163_v33 = vadd.f32 %v1142_v63, %v1083_v6  ;;  %v1102_v41 = vpop.permute.xlu1 %1101  ;;  %v1243_v6 = vrot.slane %v1194_v17, 4  ;;  %v1245_v63 = vrot.slane %v1195_v32, 4 }
 0x157   :  { %v1146_v55 = vadd.f32 %v1102_v41, %v2160_v9  ;;  %v1147_v15 = vadd.f32 %v1102_v41, %v2163_v56  ;;  %v1198_v38 = vmin.f32 %v1178_v48, 0.0  ;;  %v1199_v39 = vmin.f32 %v1179_v21, 0.0 }
 0x158   :  { %v1182_v31 = vmax.f32 %v1162_v59, 1.0  ;;  %v1183_v18 = vmax.f32 %v1163_v33, 1.0 }
 0x159   :  { %v1166_v22 = vmax.f32 %v1146_v55, 1.0  ;;  %v1167_v45 = vmax.f32 %v1147_v15, 1.0  ;;  %v1251_v1 = vrot.slane %v1198_v38, 4 }
 0x15a   :  { %v2261_v44 = vmin.f32 %v1182_v31, 0.0  ;;  %v2263_v49 = vmin.f32 %v1183_v18, 0.0  ;;  %v1107_v42 = vpop.permute.xlu1 %1106 }
 0x15b   :  { %v1186_v52 = vmin.f32 %v1166_v22, 0.0  ;;  %v1187_v9 = vmin.f32 %v1167_v45, 0.0  ;;  %v1148_v56 = vadd.f32 %v1107_v42, %v2213_v12  ;;  %v1149_v16 = vadd.f32 %v1107_v42, %v2215_v11 }
 0x15c   :  { %v1259_v58 = vrot.slane %v2261_v44, 4  ;;  %v1261_v13 = vrot.slane %v2263_v49, 4 }
 0x15d   :  { %v1227_v2 = vrot.slane %v1186_v52, 4  ;;  %v1229_v28 = vrot.slane %v1187_v9, 4  ;;  %v1168_v47 = vmax.f32 %v1148_v56, 1.0  ;;  %v1169_v34 = vmax.f32 %v1149_v16, 1.0 }
 0x15e   :  { %1305 = vst [vmem:[#allocation2 + $0x190] sm:$0x7] %v1259_v58  ;;  %1306 = vst [vmem:[#allocation2 + $0x198] sm:$0x7] %v1261_v13  ;;  %v1117_v12 = vpop.permute.xlu1 %1116 }
 0x15f   :  { %v1228_v11 = vsel %vm1224_vm1, %v1225_v35, %v1227_v2  ;;  %v1230_v62 = vsel %vm1224_vm1, %v1226_v0, %v1229_v28  ;;  %v1188_v8 = vmin.f32 %v1168_v47, 0.0  ;;  %v1189_v7 = vmin.f32 %v1169_v34, 0.0 }
 0x160   :  { %1287 = vst [vmem:[#allocation2 + $0x100] sm:$0xff] %v1228_v11  ;;  %1288 = vst [vmem:[#allocation2 + $0x108] sm:$0xff] %v1230_v62  ;;  %v1152_v29 = vadd.f32 %v1117_v12, %v2174_v51  ;;  %v1153_v19 = vadd.f32 %v1117_v12, %v2177_v61 }
 0x161   :  { %v1231_v5 = vrot.slane %v1188_v8, 4  ;;  %v1233_v57 = vrot.slane %v1189_v7, 4 }
 0x162   :  { %v1172_v25 = vmax.f32 %v1152_v29, 1.0  ;;  %v1173_v35 = vmax.f32 %v1153_v19, 1.0  ;;  %v1127_v43 = vpop.permute.xlu1 %1126 }
 0x163   :  { %v1232_v4 = vsel %vm1224_vm1, %v1227_v2, %v1231_v5  ;;  %v1234_v0 = vsel %vm1224_vm1, %v1229_v28, %v1233_v57  ;;  %v1236_v27 = vsel %vm1224_vm1, %v1231_v5, %v1235_v30  ;;  %v1238_v3 = vsel %vm1224_vm1, %v1233_v57, %v1237_v53 }
 0x164   :  { %1289 = vst [vmem:[#allocation2 + $0x110] sm:$0xff] %v1232_v4  ;;  %1290 = vst [vmem:[#allocation2 + $0x118] sm:$0xff] %v1234_v0  ;;  %v1192_v51 = vmin.f32 %v1172_v25, 0.0  ;;  %v1193_v61 = vmin.f32 %v1173_v35, 0.0  ;;  %v1156_v60 = vadd.f32 %v1127_v43, %v2184_v23  ;;  %v1157_v26 = vadd.f32 %v1127_v43, %v2187_v50 }
 0x165   :  { %1291 = vst [vmem:[#allocation2 + $0x120] sm:$0xff] %v1236_v27  ;;  %1292 = vst [vmem:[#allocation2 + $0x128] sm:$0xff] %v1238_v3 }
 0x166   :  { %v1239_v40 = vrot.slane %v1192_v51, 4  ;;  %v1241_v14 = vrot.slane %v1193_v61, 4  ;;  %v1176_v59 = vmax.f32 %v1156_v60, 1.0  ;;  %v1177_v33 = vmax.f32 %v1157_v26, 1.0  ;;  %v1137_v41 = vpop.permute.xlu1 %1136 }
 0x167   :  { %v1160_v55 = vadd.f32 %v1137_v41, %v2196_v36  ;;  %v1161_v15 = vadd.f32 %v1137_v41, %v2199_v10  ;;  %v1253_v36 = vrot.slane %v1199_v39, 4 }
 0x168   :  { %v1240_v31 = vsel %vm1224_vm1, %v1235_v30, %v1239_v40  ;;  %v1242_v18 = vsel %vm1224_vm1, %v1237_v53, %v1241_v14  ;;  %v1244_v23 = vsel %vm1224_vm1, %v1239_v40, %v1243_v6  ;;  %v1246_v50 = vsel %vm1224_vm1, %v1241_v14, %v1245_v63 }
 0x169   :  { %1293 = vst [vmem:[#allocation2 + $0x130] sm:$0xff] %v1240_v31  ;;  %1294 = vst [vmem:[#allocation2 + $0x138] sm:$0xff] %v1242_v18  ;;  %v1196_v24 = vmin.f32 %v1176_v59, 0.0  ;;  %v1197_v20 = vmin.f32 %v1177_v33, 0.0  ;;  %v1180_v22 = vmax.f32 %v1160_v55, 1.0  ;;  %v1181_v45 = vmax.f32 %v1161_v15, 1.0 }
 0x16a   :  { %1295 = vst [vmem:[#allocation2 + $0x140] sm:$0xff] %v1244_v23  ;;  %1296 = vst [vmem:[#allocation2 + $0x148] sm:$0xff] %v1246_v50 }
 0x16b   :  { %v1247_v46 = vrot.slane %v1196_v24, 4  ;;  %v1249_v10 = vrot.slane %v1197_v20, 4  ;;  %v1200_v42 = vmin.f32 %v1180_v22, 0.0  ;;  %v1201_v52 = vmin.f32 %v1181_v45, 0.0 }
 0x16d   :  { %v1248_v9 = vsel %vm1224_vm1, %v1243_v6, %v1247_v46  ;;  %v1250_v56 = vsel %vm1224_vm1, %v1245_v63, %v1249_v10  ;;  %v1252_v16 = vsel %vm1224_vm1, %v1247_v46, %v1251_v1  ;;  %v1254_v37 = vsel %vm1224_vm1, %v1249_v10, %v1253_v36 }
 0x16e   :  { %1297 = vst [vmem:[#allocation2 + $0x150] sm:$0xff] %v1248_v9  ;;  %1298 = vst [vmem:[#allocation2 + $0x158] sm:$0xff] %v1250_v56  ;;  %v1255_v54 = vrot.slane %v1200_v42, 4  ;;  %v1257_v2 = vrot.slane %v1201_v52, 4 }
 0x16f   :  { %1299 = vst [vmem:[#allocation2 + $0x160] sm:$0xff] %v1252_v16  ;;  %1300 = vst [vmem:[#allocation2 + $0x168] sm:$0xff] %v1254_v37 }
 0x170   :  { %v1256_v28 = vsel %vm1224_vm1, %v1251_v1, %v1255_v54  ;;  %v1258_v47 = vsel %vm1224_vm1, %v1253_v36, %v1257_v2  ;;  %v1260_v34 = vsel %vm1224_vm1, %v1255_v54, %v1259_v58  ;;  %v1262_v30 = vsel %vm1224_vm1, %v1257_v2, %v1261_v13 }
 0x171   :  { %1301 = vst [vmem:[#allocation2 + $0x170] sm:$0xff] %v1256_v28  ;;  %1302 = vst [vmem:[#allocation2 + $0x178] sm:$0xff] %v1258_v47 }
 0x172   :  { %1303 = vst [vmem:[#allocation2 + $0x180] sm:$0xff] %v1260_v34  ;;  %1304 = vst [vmem:[#allocation2 + $0x188] sm:$0xff] %v1262_v30 }
 0x173   :  { %1354 = shalt.err (!%p1351_p4)
}
 0x174   :  { %s1355_s26 = scalar_lea.hbm %s2328_s9, 6656 }
 0x175   :  { %p1356_p5 = scmp.ne.s32.totalorder %s2328_s9, %s1355_s26  ;;  %p1359_p6 = scmp.lt.u32.totalorder %s1355_s26, %s2328_s9 }
 0x177   :  { %p1361_p7 = pnand %p1359_p6, %p1356_p5 }
 0x179   :  { %1364 = shalt.err (!%p1361_p7)
}
 0x17a   :  { %s1371_s10 = smov 256   ;;  %s1372_s11 = smov 16  }
 0x17b   :  { %1318 = dma.vmem_to_hbm [thread:$0]  %s1313_s25, 6656, %s2328_s9, [#allocation3], %s1371_s10, %s1371_s10, %s1372_s11  }
 0x17c   :  { %1365 = dma.done.wait [#allocation3], 6656  }
 0x17d   :  { %1366 = vsyncadd [#allocation3], 4294960640 }
 0x17e   :  { %1322 = vsyncpa [#allocation3], 1 }

</bundles_post_ra>
